<compile_context>
chip_gen: v7x
topology: tpu7x:2x2x1
jax: 0.10.0
libtpu: 0.0.40
codegen_flags: <defaults>
</compile_context>

<pallas_src>
import math
from functools import partial

import numpy as np
import jax
import jax.numpy as jnp
from jax.experimental import pallas as pl
from jax.experimental.pallas import tpu as pltpu


# ------------------------- numpy sincos pos embed (glue, identical math) -----
def get_1d_sincos_pos_embed_from_grid(embed_dim, pos):
    assert embed_dim % 2 == 0
    omega = np.arange(embed_dim // 2, dtype=np.float32)
    omega /= embed_dim / 2.0
    omega = 1.0 / 10000 ** omega
    pos = pos.reshape(-1)
    out = np.einsum('m,d->md', pos, omega)
    return np.concatenate([np.sin(out), np.cos(out)], axis=1)


def get_2d_sincos_pos_embed_from_grid(embed_dim, grid):
    assert embed_dim % 2 == 0
    emb_h = get_1d_sincos_pos_embed_from_grid(embed_dim // 2, grid[0])
    emb_w = get_1d_sincos_pos_embed_from_grid(embed_dim // 2, grid[1])
    return np.concatenate([emb_h, emb_w], axis=1)


def get_2d_sincos_pos_embed(embed_dim, grid_size):
    if isinstance(grid_size, int):
        gh, gw = grid_size, grid_size
    else:
        gh, gw = grid_size[0], grid_size[1]
    grid_h = np.arange(gh, dtype=np.float32)
    grid_w = np.arange(gw, dtype=np.float32)
    grid = np.meshgrid(grid_w, grid_h)
    grid = np.stack(grid, axis=0).reshape([2, 1, gh, gw])
    return get_2d_sincos_pos_embed_from_grid(embed_dim, grid)


# ----------------------------------------------------------------- helpers ---
def _layernorm(z, w, b, eps=1e-6):
    # Module uses norm_layer=partial(nn.LayerNorm, eps=1e-06), so eps=1e-6 here.
    mu = jnp.mean(z, axis=-1, keepdims=True)
    var = jnp.mean((z - mu) ** 2, axis=-1, keepdims=True)
    return (z - mu) * jax.lax.rsqrt(var + eps) * w + b


# ------------------------------------------------------------ Pallas kernel --
def resampler_kernel(
    x_ref,          # (L, KV)      bf16  one batch element (leading dim squeezed)
    q3_ref,         # (H, Q, hd)   bf16  scale * ((ln_q(query)+pe_q) @ Wq + bq)
    kvw_ref,        # (KV, E)      bf16  kv_proj.weight.T
    lnkv_w_ref,     # (1, E)       f32
    lnkv_b_ref,     # (1, E)       f32
    wkv_ref,        # (E, 2E)      bf16  [Wk^T | Wv^T]  (fused K/V projection)
    kconst_ref,     # (L, E)       bf16  pe_k @ Wk^T + bk  (folded by linearity)
    bv_ref,         # (1, E)       f32
    wo_ref,         # (E, E)       bf16  out_proj.weight.T
    bo_ref,         # (1, E)       f32
    lnp_w_ref,      # (1, E)       f32
    lnp_b_ref,      # (1, E)       f32
    proj_ref,       # (E, E)       bf16
    out_ref,        # (Q, E)       f32
    *, num_heads,
):
    H = num_heads
    L = x_ref.shape[0]
    E = lnkv_w_ref.shape[-1]
    Q = q3_ref.shape[1]
    hd = E // H
    bf16 = jnp.bfloat16

    # kv projection (bf16 x bf16 -> f32 accumulate) + ln_kv (f32)
    kv = jnp.dot(x_ref[...], kvw_ref[...], preferred_element_type=jnp.float32)
    kv = _layernorm(kv, lnkv_w_ref[...], lnkv_b_ref[...])             # (L, E) f32

    # fused K/V projection: single (L,E)x(E,2E) matmul; pos-embed & biases folded.
    kvp = jnp.dot(kv.astype(bf16), wkv_ref[...],
                  preferred_element_type=jnp.float32)                 # (L, 2E) f32
    # cast to bf16 right away: k/v are only ever consumed in bf16 matmuls.
    k = (kvp[:, :E] + kconst_ref[...]).astype(bf16)                   # (L, E)
    v = (kvp[:, E:] + bv_ref[...]).astype(bf16)                       # (L, E)

    # head-batched attention: (H,Q,hd) x (H,L,hd) -> (H,Q,L)  (no per-head loop)
    k3 = jnp.swapaxes(k.reshape(L, H, hd), 0, 1)                      # (H, L, hd)
    v3 = jnp.swapaxes(v.reshape(L, H, hd), 0, 1)                      # (H, L, hd)
    s = jnp.einsum('hqd,hkd->hqk', q3_ref[...], k3,
                   preferred_element_type=jnp.float32)                # (H, Q, L)
    # softmax kept in f32 (v5e has no bf16 VPU/EUP path)
    s = s - jnp.max(s, axis=-1, keepdims=True)
    p = jnp.exp(s)
    p = p * pl.reciprocal(jnp.sum(p, axis=-1, keepdims=True), approx=True)
    o3 = jnp.einsum('hqk,hkd->hqd', p.astype(bf16), v3,
                    preferred_element_type=jnp.float32)               # (H, Q, hd)

    # merge heads -> (Q, E) and do ONE (Q,E)@(E,E) out-projection on the MXU;
    # the head reduction lives in the MXU accumulator (full K=E contraction).
    o2 = jnp.swapaxes(o3, 0, 1).reshape(Q, E)                         # (Q, E)
    attn_out = jnp.dot(o2.astype(bf16), wo_ref[...],
                       preferred_element_type=jnp.float32) + bo_ref[...]

    # ln_post + final projection
    xp = _layernorm(attn_out, lnp_w_ref[...], lnp_b_ref[...])
    out_ref[...] = jnp.dot(xp.astype(bf16), proj_ref[...],
                           preferred_element_type=jnp.float32).astype(out_ref.dtype)


# ----------------------------------------------------------------- wrapper ----
def resampler_forward(x, params, *, num_heads, out_dtype=jnp.float32):
    N, L, KV = x.shape
    Q, E = params["query"].shape
    H = num_heads
    assert E % H == 0, "embed_dim must be divisible by num_heads"
    hd = E // H
    f32, bf16 = jnp.float32, jnp.bfloat16

    # ------- batch-invariant precompute (hoisted out of the per-batch grid) ---
    # query path: (ln_q(query) + pos_embed) @ Wq + bq, with the 1/sqrt(hd)
    # softmax scale folded in; reshaped per head once, outside the kernel.
    q_in = _layernorm(params["query"], params["ln_q_w"], params["ln_q_b"]) \
        + params["pos_embed_q"]
    q = (q_in @ params["wq_t"] + params["bq"]) * (1.0 / math.sqrt(hd))
    q3 = jnp.transpose(q.reshape(Q, H, hd), (1, 0, 2)).astype(bf16)    # (H, Q, hd)

    # fused K/V weight and folded constants:  (kv+pe_k)@Wk + bk = kv@Wk + (pe_k@Wk + bk)
    wkv = jnp.concatenate([params["wk_t"], params["wv_t"]], axis=1).astype(bf16)
    k_const = (params["pos_embed_k"] @ params["wk_t"] + params["bk"]).astype(bf16)
    wo = params["wo_t"].astype(bf16)                                   # (E, E)

    # TODO(synk): prefer the caller handing x over already in bf16 so this cast
    #   (an extra HBM round trip of x) disappears at production sizes.
    x_bf = x if x.dtype == bf16 else x.astype(bf16)
    kvw = params["kv_w_t"].astype(bf16)
    proj = params["proj"].astype(bf16)

    operands = (
        x_bf, q3, kvw,
        params["ln_kv_w"].astype(f32), params["ln_kv_b"].astype(f32),
        wkv, k_const, params["bv"].astype(f32),
        wo, params["bo"].astype(f32),
        params["ln_post_w"].astype(f32), params["ln_post_b"].astype(f32),
        proj,
    )

    # Constant-index (batch-invariant) operands: single-buffered -- their block
    # index never changes across the batch grid, so double-buffering would just
    # double their resident VMEM footprint.
    single = pl.Buffered(1)
    const2d = lambda shape: pl.BlockSpec(shape, lambda b: (0, 0), pipeline_mode=single)
    const3d = lambda shape: pl.BlockSpec(shape, lambda b: (0, 0, 0), pipeline_mode=single)

    in_specs = [
        pl.BlockSpec((None, L, KV), lambda b: (b, 0, 0)),   # x: batch-sliced, squeezed
        const3d((H, Q, hd)),                                # q3
        const2d((KV, E)),                                   # kv_proj W^T
        const2d((1, E)), const2d((1, E)),                   # ln_kv w/b
        const2d((E, 2 * E)),                                # [Wk | Wv]^T
        const2d((L, E)),                                    # pe_k @ Wk + bk (bf16)
        const2d((1, E)),                                    # bv
        const2d((E, E)),                                    # Wo^T
        const2d((1, E)),                                    # bo
        const2d((1, E)), const2d((1, E)),                   # ln_post w/b
        const2d((E, E)),                                    # proj
    ]
    # NOTE: at production sizes embed_dim is a multiple of 128 -> lane-dense stores.
    out_spec = pl.BlockSpec((None, Q, E), lambda b: (b, 0, 0))

    # VMEM budget: 2x for the double-buffered batch-varying blocks (x, out),
    # 1x for the single-buffered constants, plus headroom for in-kernel
    # temporaries; clamped against this generation's physical VMEM capacity.
    const_bytes = sum(int(np.prod(a.shape)) * a.dtype.itemsize for a in operands[1:])
    x_block_bytes = L * KV * x_bf.dtype.itemsize
    out_block_bytes = Q * E * np.dtype(out_dtype).itemsize
    try:
        vmem_cap = int(pltpu.get_tpu_info().vmem_capacity_bytes)
    except Exception:
        vmem_cap = 64 << 20   # assume the smallest (v7x per-TC) capacity
    vmem_limit = 2 * (x_block_bytes + out_block_bytes) + const_bytes + (8 << 20)
    vmem_limit = int(min(max(vmem_limit, 16 << 20), (vmem_cap * 7) // 8))

    fn = pl.pallas_call(
        partial(resampler_kernel, num_heads=num_heads),
        out_shape=jax.ShapeDtypeStruct((N, Q, E), out_dtype),
        grid=(N,),
        in_specs=in_specs,
        out_specs=out_spec,
        compiler_params=pltpu.CompilerParams(
            dimension_semantics=("parallel",),
            vmem_limit_bytes=vmem_limit,
        ),
    )
    return fn(*operands)


# --------------------------------------------------- pure-JAX reference ------
def resampler_reference(x, params, *, num_heads):
    eps = 1e-6

    def ln(z, w, b):
        mu = jnp.mean(z, axis=-1, keepdims=True)
        var = jnp.mean((z - mu) ** 2, axis=-1, keepdims=True)
        return (z - mu) / jnp.sqrt(var + eps) * w + b

    kv = ln(x @ params["kv_w_t"], params["ln_kv_w"], params["ln_kv_b"])   # (N,L,E)
    k_in = kv + params["pos_embed_k"][None]
    v_in = kv
    q_in = ln(params["query"], params["ln_q_w"], params["ln_q_b"]) + params["pos_embed_q"]

    q = q_in @ params["wq_t"] + params["bq"]                              # (Q,E)
    k = k_in @ params["wk_t"] + params["bk"]                              # (N,L,E)
    v = v_in @ params["wv_t"] + params["bv"]

    N, L, E = k.shape
    Q = q.shape[0]
    H = num_heads
    hd = E // H
    qh = q.reshape(Q, H, hd).transpose(1, 0, 2)                           # (H,Q,hd)
    kh = k.reshape(N, L, H, hd).transpose(0, 2, 1, 3)                     # (N,H,L,hd)
    vh = v.reshape(N, L, H, hd).transpose(0, 2, 1, 3)
    s = jnp.einsum("hqd,nhld->nhql", qh, kh) / math.sqrt(hd)
    p = jax.nn.softmax(s, axis=-1)
    o = jnp.einsum("nhql,nhld->nhqd", p, vh).transpose(0, 2, 1, 3).reshape(N, Q, E)
    attn_out = o @ params["wo_t"] + params["bo"]
    xp = ln(attn_out, params["ln_post_w"], params["ln_post_b"])
    return xp @ params["proj"]


# -------------------------------------------------------------------- main ----
if __name__ == "__main__":
    # Module config (small, consistent with Resampler.__init__)
    grid_size = 4          # num_queries = 16
    embed_dim = 32
    num_heads = 4
    kv_dim = 24
    batch = 2
    tgt_size = (2, 4)      # adaptive pos embed -> key/value sequence length L = 8
    L = tgt_size[0] * tgt_size[1]
    Q = grid_size ** 2

    key = jax.random.PRNGKey(0)
    ks = jax.random.split(key, 10)

    f32 = jnp.float32
    params = {
        "pos_embed_q": jnp.asarray(get_2d_sincos_pos_embed(embed_dim, grid_size), f32),
        "pos_embed_k": jnp.asarray(get_2d_sincos_pos_embed(embed_dim, tgt_size), f32),
        "query":  0.02 * jax.random.normal(ks[0], (Q, embed_dim), f32),
        "kv_w_t": (0.02 * jax.random.normal(ks[1], (embed_dim, kv_dim), f32)).T,
        "ln_kv_w": jnp.ones((1, embed_dim), f32),  "ln_kv_b": jnp.zeros((1, embed_dim), f32),
        "ln_q_w":  jnp.ones((1, embed_dim), f32),  "ln_q_b":  jnp.zeros((1, embed_dim), f32),
        "wq_t": (0.02 * jax.random.normal(ks[2], (embed_dim, embed_dim), f32)).T,
        "wk_t": (0.02 * jax.random.normal(ks[3], (embed_dim, embed_dim), f32)).T,
        "wv_t": (0.02 * jax.random.normal(ks[4], (embed_dim, embed_dim), f32)).T,
        "bq": jnp.zeros((1, embed_dim), f32),
        "bk": jnp.zeros((1, embed_dim), f32),
        "bv": jnp.zeros((1, embed_dim), f32),
        "wo_t": (0.02 * jax.random.normal(ks[5], (embed_dim, embed_dim), f32)).T,
        "bo": jnp.zeros((1, embed_dim), f32),
        "ln_post_w": jnp.ones((1, embed_dim), f32), "ln_post_b": jnp.zeros((1, embed_dim), f32),
        "proj": embed_dim ** (-0.5) * jax.random.normal(ks[6], (embed_dim, embed_dim), f32),
    }

    x = jax.random.normal(ks[7], (batch, L, kv_dim), f32)

    out = resampler_forward(x, params, num_heads=num_heads)
    out = jax.block_until_ready(out)
    assert out.shape == (batch, Q, embed_dim), out.shape

    # Reference is full f32 module math; kernel uses bf16 matmul inputs with f32
    # accumulation (and an approx EUP reciprocal in the softmax), so the
    # tolerance is loosened accordingly.
    ref = resampler_reference(x, params, num_heads=num_heads)
    np.testing.assert_allclose(np.asarray(out), np.asarray(ref), rtol=5e-2, atol=5e-2)

    print("KERNEL_OK")
</pallas_src>

<mosaic_0001>
module attributes {stable_mosaic.version = 11 : i64} {
  func.func @resampler_kernel(%arg0: i32, %arg1: memref<1x8x24xbf16, #tpu.memory_space<vmem>>, %arg2: memref<4x16x8xbf16, #tpu.memory_space<vmem>>, %arg3: memref<24x32xbf16, #tpu.memory_space<vmem>>, %arg4: memref<1x32xf32, #tpu.memory_space<vmem>>, %arg5: memref<1x32xf32, #tpu.memory_space<vmem>>, %arg6: memref<32x64xbf16, #tpu.memory_space<vmem>>, %arg7: memref<8x32xbf16, #tpu.memory_space<vmem>>, %arg8: memref<1x32xf32, #tpu.memory_space<vmem>>, %arg9: memref<32x32xbf16, #tpu.memory_space<vmem>>, %arg10: memref<1x32xf32, #tpu.memory_space<vmem>>, %arg11: memref<1x32xf32, #tpu.memory_space<vmem>>, %arg12: memref<1x32xf32, #tpu.memory_space<vmem>>, %arg13: memref<32x32xbf16, #tpu.memory_space<vmem>>, %arg14: memref<1x16x32xf32, #tpu.memory_space<vmem>>) attributes {dimension_semantics = [#tpu.dimension_semantics<parallel>], iteration_bounds = array<i64: 2>, scalar_prefetch = 0 : i64, scratch_operands = 0 : i64, tpu.core_type = #tpu.core_type<tc>, window_params = [{transform_indices = @transform_0, window_bounds = array<i64: 1, 8, 24>}, {pipeline_mode = #tpu.pipeline_mode<synchronous>, transform_indices = @transform_1, window_bounds = array<i64: 4, 16, 8>}, {pipeline_mode = #tpu.pipeline_mode<synchronous>, transform_indices = @transform_2, window_bounds = array<i64: 24, 32>}, {pipeline_mode = #tpu.pipeline_mode<synchronous>, transform_indices = @transform_3, window_bounds = array<i64: 1, 32>}, {pipeline_mode = #tpu.pipeline_mode<synchronous>, transform_indices = @transform_4, window_bounds = array<i64: 1, 32>}, {pipeline_mode = #tpu.pipeline_mode<synchronous>, transform_indices = @transform_5, window_bounds = array<i64: 32, 64>}, {pipeline_mode = #tpu.pipeline_mode<synchronous>, transform_indices = @transform_6, window_bounds = array<i64: 8, 32>}, {pipeline_mode = #tpu.pipeline_mode<synchronous>, transform_indices = @transform_7, window_bounds = array<i64: 1, 32>}, {pipeline_mode = #tpu.pipeline_mode<synchronous>, transform_indices = @transform_8, window_bounds = array<i64: 32, 32>}, {pipeline_mode = #tpu.pipeline_mode<synchronous>, transform_indices = @transform_9, window_bounds = array<i64: 1, 32>}, {pipeline_mode = #tpu.pipeline_mode<synchronous>, transform_indices = @transform_10, window_bounds = array<i64: 1, 32>}, {pipeline_mode = #tpu.pipeline_mode<synchronous>, transform_indices = @transform_11, window_bounds = array<i64: 1, 32>}, {pipeline_mode = #tpu.pipeline_mode<synchronous>, transform_indices = @transform_12, window_bounds = array<i64: 32, 32>}, {transform_indices = @transform_13, window_bounds = array<i64: 1, 16, 32>}]} {
    %c0 = arith.constant 0 : index
    %c0_0 = arith.constant 0 : index
    %c0_1 = arith.constant 0 : index
    %0 = vector.load %arg1[%c0, %c0_0, %c0_1] : memref<1x8x24xbf16, #tpu.memory_space<vmem>>, vector<1x8x24xbf16>
    %1 = vector.shape_cast %0 : vector<1x8x24xbf16> to vector<8x24xbf16>
    %c0_2 = arith.constant 0 : index
    %c0_3 = arith.constant 0 : index
    %2 = vector.load %arg3[%c0_2, %c0_3] : memref<24x32xbf16, #tpu.memory_space<vmem>>, vector<24x32xbf16>
    %cst = arith.constant dense<0.000000e+00> : vector<8x32xf32>
    %3 = tpu.matmul %1, %2, %cst {dimension_numbers = #tpu.dot_dimension_numbers<[1], [0], [0], [1], [0, 0, 1, 1], [], []>} : vector<8x24xbf16>, vector<24x32xbf16>, vector<8x32xf32> -> vector<8x32xf32>
    %c0_4 = arith.constant 0 : index
    %c0_5 = arith.constant 0 : index
    %4 = vector.load %arg4[%c0_4, %c0_5] : memref<1x32xf32, #tpu.memory_space<vmem>>, vector<1x32xf32>
    %c0_6 = arith.constant 0 : index
    %c0_7 = arith.constant 0 : index
    %5 = vector.load %arg5[%c0_6, %c0_7] : memref<1x32xf32, #tpu.memory_space<vmem>>, vector<1x32xf32>
    %cst_8 = arith.constant dense<0.000000e+00> : vector<8xf32>
    %6 = vector.multi_reduction <add>, %3, %cst_8 [1] : vector<8x32xf32> to vector<8xf32>
    %7 = vector.shape_cast %6 : vector<8xf32> to vector<8x1xf32>
    %cst_9 = arith.constant 3.200000e+01 : f32
    %8 = vector.broadcast %cst_9 : f32 to vector<8x1xf32>
    %9 = arith.divf %7, %8 : vector<8x1xf32>
    %10 = vector.broadcast %9 : vector<8x1xf32> to vector<8x32xf32>
    %11 = arith.subf %3, %10 : vector<8x32xf32>
    %12 = arith.mulf %11, %11 : vector<8x32xf32>
    %cst_10 = arith.constant dense<0.000000e+00> : vector<8xf32>
    %13 = vector.multi_reduction <add>, %12, %cst_10 [1] : vector<8x32xf32> to vector<8xf32>
    %14 = vector.shape_cast %13 : vector<8xf32> to vector<8x1xf32>
    %cst_11 = arith.constant 3.200000e+01 : f32
    %15 = vector.broadcast %cst_11 : f32 to vector<8x1xf32>
    %16 = arith.divf %14, %15 : vector<8x1xf32>
    %17 = vector.broadcast %9 : vector<8x1xf32> to vector<8x32xf32>
    %18 = arith.subf %3, %17 : vector<8x32xf32>
    %cst_12 = arith.constant 9.99999997E-7 : f32
    %19 = vector.broadcast %cst_12 : f32 to vector<8x1xf32>
    %20 = arith.addf %16, %19 : vector<8x1xf32>
    %21 = math.rsqrt %20 : vector<8x1xf32>
    %22 = vector.broadcast %21 : vector<8x1xf32> to vector<8x32xf32>
    %23 = arith.mulf %18, %22 : vector<8x32xf32>
    %24 = vector.broadcast %4 : vector<1x32xf32> to vector<8x32xf32>
    %25 = arith.mulf %23, %24 : vector<8x32xf32>
    %26 = vector.broadcast %5 : vector<1x32xf32> to vector<8x32xf32>
    %27 = arith.addf %25, %26 : vector<8x32xf32>
    %28 = arith.truncf %27 : vector<8x32xf32> to vector<8x32xbf16>
    %c0_13 = arith.constant 0 : index
    %c0_14 = arith.constant 0 : index
    %29 = vector.load %arg6[%c0_13, %c0_14] : memref<32x64xbf16, #tpu.memory_space<vmem>>, vector<32x64xbf16>
    %cst_15 = arith.constant dense<0.000000e+00> : vector<8x64xf32>
    %30 = tpu.matmul %28, %29, %cst_15 {dimension_numbers = #tpu.dot_dimension_numbers<[1], [0], [0], [1], [0, 0, 1, 1], [], []>} : vector<8x32xbf16>, vector<32x64xbf16>, vector<8x64xf32> -> vector<8x64xf32>
    %31 = vector.extract_strided_slice %30 {offsets = [0, 0], sizes = [8, 32], strides = [1, 1]} : vector<8x64xf32> to vector<8x32xf32>
    %c0_16 = arith.constant 0 : index
    %c0_17 = arith.constant 0 : index
    %32 = vector.load %arg7[%c0_16, %c0_17] : memref<8x32xbf16, #tpu.memory_space<vmem>>, vector<8x32xbf16>
    %33 = arith.extf %32 : vector<8x32xbf16> to vector<8x32xf32>
    %34 = arith.addf %31, %33 : vector<8x32xf32>
    %35 = arith.truncf %34 : vector<8x32xf32> to vector<8x32xbf16>
    %36 = vector.extract_strided_slice %30 {offsets = [0, 32], sizes = [8, 32], strides = [1, 1]} : vector<8x64xf32> to vector<8x32xf32>
    %c0_18 = arith.constant 0 : index
    %c0_19 = arith.constant 0 : index
    %37 = vector.load %arg8[%c0_18, %c0_19] : memref<1x32xf32, #tpu.memory_space<vmem>>, vector<1x32xf32>
    %38 = vector.broadcast %37 : vector<1x32xf32> to vector<8x32xf32>
    %39 = arith.addf %36, %38 : vector<8x32xf32>
    %40 = arith.truncf %39 : vector<8x32xf32> to vector<8x32xbf16>
    %41 = vector.shape_cast %35 : vector<8x32xbf16> to vector<8x4x8xbf16>
    %42 = tpu.transpose %41, [1, 0, 2] : vector<8x4x8xbf16> -> vector<4x8x8xbf16>
    %43 = vector.shape_cast %40 : vector<8x32xbf16> to vector<8x4x8xbf16>
    %44 = tpu.transpose %43, [1, 0, 2] : vector<8x4x8xbf16> -> vector<4x8x8xbf16>
    %c0_20 = arith.constant 0 : index
    %c0_21 = arith.constant 0 : index
    %c0_22 = arith.constant 0 : index
    %45 = vector.load %arg2[%c0_20, %c0_21, %c0_22] : memref<4x16x8xbf16, #tpu.memory_space<vmem>>, vector<4x16x8xbf16>
    "tpu.trace_start"() <{level = 10 : i32, message = "hqd,hkd->hqk"}> : () -> ()
    %cst_23 = arith.constant dense<0.000000e+00> : vector<4x16x8xf32>
    %46 = tpu.matmul %45, %42, %cst_23 {dimension_numbers = #tpu.dot_dimension_numbers<[2], [2], [1], [1], [0, 0, 0, 1, 1, 1], [0], [0]>} : vector<4x16x8xbf16>, vector<4x8x8xbf16>, vector<4x16x8xf32> -> vector<4x16x8xf32>
    "tpu.trace_stop"() : () -> ()
    %cst_24 = arith.constant dense<0xFF800000> : vector<4x16xf32>
    %47 = vector.multi_reduction <maximumf>, %46, %cst_24 [2] : vector<4x16x8xf32> to vector<4x16xf32>
    %48 = vector.shape_cast %47 : vector<4x16xf32> to vector<4x16x1xf32>
    %49 = vector.broadcast %48 : vector<4x16x1xf32> to vector<4x16x8xf32>
    %50 = arith.subf %46, %49 : vector<4x16x8xf32>
    %51 = math.exp %50 : vector<4x16x8xf32>
    %cst_25 = arith.constant dense<0.000000e+00> : vector<4x16xf32>
    %52 = vector.multi_reduction <add>, %51, %cst_25 [2] : vector<4x16x8xf32> to vector<4x16xf32>
    %53 = vector.shape_cast %52 : vector<4x16xf32> to vector<4x16x1xf32>
    %54 = tpu.reciprocal %53 {approx = true} : vector<4x16x1xf32> -> vector<4x16x1xf32>
    %55 = vector.broadcast %54 : vector<4x16x1xf32> to vector<4x16x8xf32>
    %56 = arith.mulf %51, %55 : vector<4x16x8xf32>
    %57 = arith.truncf %56 : vector<4x16x8xf32> to vector<4x16x8xbf16>
    "tpu.trace_start"() <{level = 10 : i32, message = "hqk,hkd->hqd"}> : () -> ()
    %cst_26 = arith.constant dense<0.000000e+00> : vector<4x16x8xf32>
    %58 = tpu.matmul %57, %44, %cst_26 {dimension_numbers = #tpu.dot_dimension_numbers<[2], [1], [1], [2], [0, 0, 0, 1, 1, 2], [0], [0]>} : vector<4x16x8xbf16>, vector<4x8x8xbf16>, vector<4x16x8xf32> -> vector<4x16x8xf32>
    "tpu.trace_stop"() : () -> ()
    %59 = tpu.transpose %58, [1, 0, 2] : vector<4x16x8xf32> -> vector<16x4x8xf32>
    %60 = vector.shape_cast %59 : vector<16x4x8xf32> to vector<16x32xf32>
    %61 = arith.truncf %60 : vector<16x32xf32> to vector<16x32xbf16>
    %c0_27 = arith.constant 0 : index
    %c0_28 = arith.constant 0 : index
    %62 = vector.load %arg9[%c0_27, %c0_28] : memref<32x32xbf16, #tpu.memory_space<vmem>>, vector<32x32xbf16>
    %cst_29 = arith.constant dense<0.000000e+00> : vector<16x32xf32>
    %63 = tpu.matmul %61, %62, %cst_29 {dimension_numbers = #tpu.dot_dimension_numbers<[1], [0], [0], [1], [0, 0, 1, 1], [], []>} : vector<16x32xbf16>, vector<32x32xbf16>, vector<16x32xf32> -> vector<16x32xf32>
    %c0_30 = arith.constant 0 : index
    %c0_31 = arith.constant 0 : index
    %64 = vector.load %arg10[%c0_30, %c0_31] : memref<1x32xf32, #tpu.memory_space<vmem>>, vector<1x32xf32>
    %65 = vector.broadcast %64 : vector<1x32xf32> to vector<16x32xf32>
    %66 = arith.addf %63, %65 : vector<16x32xf32>
    %c0_32 = arith.constant 0 : index
    %c0_33 = arith.constant 0 : index
    %67 = vector.load %arg11[%c0_32, %c0_33] : memref<1x32xf32, #tpu.memory_space<vmem>>, vector<1x32xf32>
    %c0_34 = arith.constant 0 : index
    %c0_35 = arith.constant 0 : index
    %68 = vector.load %arg12[%c0_34, %c0_35] : memref<1x32xf32, #tpu.memory_space<vmem>>, vector<1x32xf32>
    %cst_36 = arith.constant dense<0.000000e+00> : vector<16xf32>
    %69 = vector.multi_reduction <add>, %66, %cst_36 [1] : vector<16x32xf32> to vector<16xf32>
    %70 = vector.shape_cast %69 : vector<16xf32> to vector<16x1xf32>
    %cst_37 = arith.constant 3.200000e+01 : f32
    %71 = vector.broadcast %cst_37 : f32 to vector<16x1xf32>
    %72 = arith.divf %70, %71 : vector<16x1xf32>
    %73 = vector.broadcast %72 : vector<16x1xf32> to vector<16x32xf32>
    %74 = arith.subf %66, %73 : vector<16x32xf32>
    %75 = arith.mulf %74, %74 : vector<16x32xf32>
    %cst_38 = arith.constant dense<0.000000e+00> : vector<16xf32>
    %76 = vector.multi_reduction <add>, %75, %cst_38 [1] : vector<16x32xf32> to vector<16xf32>
    %77 = vector.shape_cast %76 : vector<16xf32> to vector<16x1xf32>
    %cst_39 = arith.constant 3.200000e+01 : f32
    %78 = vector.broadcast %cst_39 : f32 to vector<16x1xf32>
    %79 = arith.divf %77, %78 : vector<16x1xf32>
    %80 = vector.broadcast %72 : vector<16x1xf32> to vector<16x32xf32>
    %81 = arith.subf %66, %80 : vector<16x32xf32>
    %cst_40 = arith.constant 9.99999997E-7 : f32
    %82 = vector.broadcast %cst_40 : f32 to vector<16x1xf32>
    %83 = arith.addf %79, %82 : vector<16x1xf32>
    %84 = math.rsqrt %83 : vector<16x1xf32>
    %85 = vector.broadcast %84 : vector<16x1xf32> to vector<16x32xf32>
    %86 = arith.mulf %81, %85 : vector<16x32xf32>
    %87 = vector.broadcast %67 : vector<1x32xf32> to vector<16x32xf32>
    %88 = arith.mulf %86, %87 : vector<16x32xf32>
    %89 = vector.broadcast %68 : vector<1x32xf32> to vector<16x32xf32>
    %90 = arith.addf %88, %89 : vector<16x32xf32>
    %91 = arith.truncf %90 : vector<16x32xf32> to vector<16x32xbf16>
    %c0_41 = arith.constant 0 : index
    %c0_42 = arith.constant 0 : index
    %92 = vector.load %arg13[%c0_41, %c0_42] : memref<32x32xbf16, #tpu.memory_space<vmem>>, vector<32x32xbf16>
    %cst_43 = arith.constant dense<0.000000e+00> : vector<16x32xf32>
    %93 = tpu.matmul %91, %92, %cst_43 {dimension_numbers = #tpu.dot_dimension_numbers<[1], [0], [0], [1], [0, 0, 1, 1], [], []>} : vector<16x32xbf16>, vector<32x32xbf16>, vector<16x32xf32> -> vector<16x32xf32>
    %c0_44 = arith.constant 0 : index
    %c0_45 = arith.constant 0 : index
    %c0_46 = arith.constant 0 : index
    %94 = vector.load %arg14[%c0_44, %c0_45, %c0_46] : memref<1x16x32xf32, #tpu.memory_space<vmem>>, vector<1x16x32xf32>
    %95 = vector.shape_cast %94 : vector<1x16x32xf32> to vector<16x32xf32>
    %96 = vector.shape_cast %93 : vector<16x32xf32> to vector<1x16x32xf32>
    tpu.vector_store %arg14[%c0_44, %c0_45, %c0_46], %96 {strides = array<i32>} : memref<1x16x32xf32, #tpu.memory_space<vmem>>, vector<1x16x32xf32>,
    return
  }
  func.func @transform_0(%arg0: i32) -> (i32, i32, i32) {
    %c0_i32 = arith.constant 0 : i32
    %c0_i32_0 = arith.constant 0 : i32
    %c0_i32_1 = arith.constant 0 : i32
    return %arg0, %c0_i32, %c0_i32_0 : i32, i32, i32
  }
  func.func @transform_1(%arg0: i32) -> (i32, i32, i32) {
    %c0_i32 = arith.constant 0 : i32
    %c0_i32_0 = arith.constant 0 : i32
    %c0_i32_1 = arith.constant 0 : i32
    %c0_i32_2 = arith.constant 0 : i32
    return %c0_i32, %c0_i32_0, %c0_i32_1 : i32, i32, i32
  }
  func.func @transform_2(%arg0: i32) -> (i32, i32) {
    %c0_i32 = arith.constant 0 : i32
    %c0_i32_0 = arith.constant 0 : i32
    %c0_i32_1 = arith.constant 0 : i32
    return %c0_i32, %c0_i32_0 : i32, i32
  }
  func.func @transform_3(%arg0: i32) -> (i32, i32) {
    %c0_i32 = arith.constant 0 : i32
    %c0_i32_0 = arith.constant 0 : i32
    %c0_i32_1 = arith.constant 0 : i32
    return %c0_i32, %c0_i32_0 : i32, i32
  }
  func.func @transform_4(%arg0: i32) -> (i32, i32) {
    %c0_i32 = arith.constant 0 : i32
    %c0_i32_0 = arith.constant 0 : i32
    %c0_i32_1 = arith.constant 0 : i32
    return %c0_i32, %c0_i32_0 : i32, i32
  }
  func.func @transform_5(%arg0: i32) -> (i32, i32) {
    %c0_i32 = arith.constant 0 : i32
    %c0_i32_0 = arith.constant 0 : i32
    %c0_i32_1 = arith.constant 0 : i32
    return %c0_i32, %c0_i32_0 : i32, i32
  }
  func.func @transform_6(%arg0: i32) -> (i32, i32) {
    %c0_i32 = arith.constant 0 : i32
    %c0_i32_0 = arith.constant 0 : i32
    %c0_i32_1 = arith.constant 0 : i32
    return %c0_i32, %c0_i32_0 : i32, i32
  }
  func.func @transform_7(%arg0: i32) -> (i32, i32) {
    %c0_i32 = arith.constant 0 : i32
    %c0_i32_0 = arith.constant 0 : i32
    %c0_i32_1 = arith.constant 0 : i32
    return %c0_i32, %c0_i32_0 : i32, i32
  }
  func.func @transform_8(%arg0: i32) -> (i32, i32) {
    %c0_i32 = arith.constant 0 : i32
    %c0_i32_0 = arith.constant 0 : i32
    %c0_i32_1 = arith.constant 0 : i32
    return %c0_i32, %c0_i32_0 : i32, i32
  }
  func.func @transform_9(%arg0: i32) -> (i32, i32) {
    %c0_i32 = arith.constant 0 : i32
    %c0_i32_0 = arith.constant 0 : i32
    %c0_i32_1 = arith.constant 0 : i32
    return %c0_i32, %c0_i32_0 : i32, i32
  }
  func.func @transform_10(%arg0: i32) -> (i32, i32) {
    %c0_i32 = arith.constant 0 : i32
    %c0_i32_0 = arith.constant 0 : i32
    %c0_i32_1 = arith.constant 0 : i32
    return %c0_i32, %c0_i32_0 : i32, i32
  }
  func.func @transform_11(%arg0: i32) -> (i32, i32) {
    %c0_i32 = arith.constant 0 : i32
    %c0_i32_0 = arith.constant 0 : i32
    %c0_i32_1 = arith.constant 0 : i32
    return %c0_i32, %c0_i32_0 : i32, i32
  }
  func.func @transform_12(%arg0: i32) -> (i32, i32) {
    %c0_i32 = arith.constant 0 : i32
    %c0_i32_0 = arith.constant 0 : i32
    %c0_i32_1 = arith.constant 0 : i32
    return %c0_i32, %c0_i32_0 : i32, i32
  }
  func.func @transform_13(%arg0: i32) -> (i32, i32, i32) {
    %c0_i32 = arith.constant 0 : i32
    %c0_i32_0 = arith.constant 0 : i32
    %c0_i32_1 = arith.constant 0 : i32
    return %arg0, %c0_i32, %c0_i32_0 : i32, i32, i32
  }
}

</mosaic_0001>

<bundles_post_ra>
// kernel: tpu_custom_call.1
= control target key start
LH: loop header
LB: loop body
LE: loop exit
PB: predicated region body
PF: predicated region fallthrough
CT: control target
= control target key end

     0   :  { %s3042_s0 = inlined_call_operand.hbm [shape: bf16[2,8,24], index: 0, kind: input, shape index: {}]   ;;  %s3043_s1 = inlined_call_operand.vmem [shape: bf16[4,16,8], index: 1, kind: input, shape index: {}]   ;;  %s3044_s2 = inlined_call_operand.hbm [shape: bf16[24,32], index: 2, kind: input, shape index: {}]   ;;  %s3045_s3 = inlined_call_operand.vmem [shape: f32[1,32], index: 3, kind: input, shape index: {}]   ;;  %s3046_s4 = inlined_call_operand.vmem [shape: f32[1,32], index: 4, kind: input, shape index: {}]   ;;  %s3047_s5 = inlined_call_operand.vmem [shape: bf16[32,64], index: 5, kind: input, shape index: {}]   ;;  %s3048_s6 = inlined_call_operand.vmem [shape: bf16[8,32], index: 6, kind: input, shape index: {}]   ;;  %s3049_s7 = inlined_call_operand.vmem [shape: f32[1,32], index: 7, kind: input, shape index: {}]   ;;  %s3050_s8 = inlined_call_operand.vmem [shape: bf16[32,32], index: 8, kind: input, shape index: {}]   ;;  %s3051_s9 = inlined_call_operand.vmem [shape: f32[1,32], index: 9, kind: input, shape index: {}]   ;;  %s3052_s10 = inlined_call_operand.vmem [shape: f32[1,32], index: 10, kind: input, shape index: {}]   ;;  %s3053_s11 = inlined_call_operand.vmem [shape: f32[1,32], index: 11, kind: input, shape index: {}]   ;;  %s3054_s12 = inlined_call_operand.vmem [shape: bf16[32,32], index: 12, kind: input, shape index: {}]   ;;  %s3055_s13 = inlined_call_operand.hbm [shape: f32[2,16,32], index: 13, kind: output, shape index: {}]  }
   0x1   :  { %3064 = sst [smem:[#allocation14_spill]] %s3052_s10 }
   0x2   :  { %3065 = sst [smem:[#allocation15_spill]] %s3053_s11 }
   0x3   :  { %3066 = sst [smem:[#allocation16_spill]] %s3055_s13 }
   0x4   :  { %18 = vsyncpa [#allocation3], 0 }
   0x5   :  { %20 = vsyncpa [#allocation3 + $0x1], 0 }
   0x6   :  { %21 = vsyncpa [#allocation6], 0 }
   0x7   :  { %22 = vsyncpa [#allocation4], 0 }
   0x8   :  { %24 = vsyncpa [#allocation4 + $0x1], 0  ;;  %s2571_s25 = smov 0   ;;  %s2573_s26 = smov 0  }
   0x9   :  { %s2575_s27 = smov 0   ;;  %s2577_s28 = smov 0  }
   0xa LB: > { %3067 = sst [smem:[#allocation11_spill]] %s2468_s25  ;;  %s2592_s29 = sadd.s32 4294967295, %s2480_s28   ;;  %s2480_s28 = sphi %s2577_s28, %s3088_s28   ;;  %s2476_s27 = sphi %s2575_s27, %s3091_s27   ;;  %s2472_s26 = sphi %s2573_s26, %s3090_s26   ;;  %s2468_s25 = sphi %s2571_s25, %s3089_s25  }
   0xb   : > { %s2056_s30 = sadd.s32 4294967294, %s2480_s28   ;;  %p50_p0 = scmp.ne.s32.totalorder %s2472_s26, %s2468_s25 }
   0xc   : > { %p3061_p1 = scmp.eq.s32.totalorder %s2592_s29, 0  ;;  %p332_p3 = scmp.eq.s32.totalorder %s2056_s30, 1 }
   0xd   : > { %p2057_p5 = scmp.ge.s32.totalorder %s2480_s28, 1  ;;  %p339_p7 = scmp.lt.s32.totalorder %s2480_s28, 3 }
   0xe   : > { %p2601_p4 = por %p3061_p1, %p50_p0  ;;  %p2606_p6 = por %p332_p3, %p50_p0 }
   0xf   : > { %p2611_p8 = pnand %p2057_p5, %p339_p7  ;;  %s2482_s17 = smov [#allocation5]  }
  0x10   : > { %s3068_s14 = scalar_select %p2601_p4, 1, 0 }
  0x11   : > { %s3069_s15 = scalar_select %p2606_p6, 1, 0 }
  0x12   : > { %s3071_s16 = scalar_select %p2611_p8, 1, 0 }
  0x13   : > { %3070 = sst [smem:[#allocation12_spill]] %s3069_s15  ;;  %s354_s18 = sshll.u32 %s2482_s17, 4  ;;  %s2615_s18 = int_to_ptr.vmem [resolvable:$true] %s354_s18 }
  0x14   : > { %p2222_p9 = pneg %p2611_p8  ;;  %s2627_s20 = sadd.s32 1, %s2480_s28  }
  0x15   : > { %3073 = sst [smem:[#allocation13_spill]] %s2627_s20  ;;  %s37_s21 = sadd.s32 1, %s2476_s27 }
  0x16   : > { %p2622_p11 = pnand %p2222_p9, %p3061_p1  ;;  %s34_s22 = ssub.s32 %s2480_s28, %s2627_s20 }
  0x17   : > { %s2352_s30 = scalar_lea.hbm %s3044_s2, 192 }
  0x18   : > { %p2353_p12 = scmp.ne.s32.totalorder %s3044_s2, %s2352_s30  ;;  %p2354_p13 = pneg %p2622_p11 }
  0x19   : > { %p2359_p5 = scmp.lt.u32.totalorder %s2352_s30, %s3044_s2 }
  0x1a   : > { %p2355_p0 = pnand %p2354_p13, %p2353_p12 }
  0x1c   : > { %p2356_p3 = pneg %p2355_p0 }
  0x1e   : > { %p2361_p7 = pnand %p2359_p5, %p2356_p3 }
  0x20   : > { %2364 = shalt.err (!%p2361_p7)
}
  0x21   : > { %s2365_s20 = scalar_lea.vmem %s2615_s18, 192  ;;  %p2373_p2 = scmp.lt.s32.totalorder %s2615_s18, %s2615_s18 }
  0x22   : > { %p2366_p9 = scmp.ne.s32.totalorder %s2615_s18, %s2365_s20  ;;  %p2374_p6 = scmp.lt.s32.totalorder %s2365_s20, %s2365_s20 }
  0x24   : > { %p2368_p10 = pnand %p2366_p9, %p2354_p13  ;;  %p2375_p4 = por %p2374_p6, %p2373_p2 }
  0x26   : > { %p2369_p1 = pneg %p2368_p10 }
  0x28   : > { %p2376_p8 = pnand %p2375_p4, %p2369_p1 }
  0x2a   : > { %2379 = shalt.err (!%p2376_p8)
}
  0x2b   : > { %s2483_s15 = smov 64   ;;  %s2484_s13 = smov 4  }
  0x2c   : > { %2225 = dma.hbm_to_vmem [thread:$0]  (!%p2622_p11), %s3044_s2, 192, %s2615_s18, [#allocation6], %s2483_s15, %s2483_s15, %s2484_s13  }
  0x2d   : > { %p35_p2 = scmp.eq.s32.totalorder %s34_s22, 0  ;;  %p44_p1 = scmp.ne.s32.totalorder %s2476_s27, %s2472_s26 }
  0x2e   : > { %p45_p4 = scmp.eq.s32.totalorder %s2480_s28, 0  ;;  %p2235_p6 = scmp.lt.s32.totalorder %s2480_s28, 2 }
  0x2f   : > { %s2658_s20 = scalar_select %p35_p2, %s2476_s27, %s37_s21  }
  0x30   : > { %p46_p8 = por %p45_p4, %p44_p1  ;;  %p3074_p10 = scmp.eq.s32.totalorder %s2592_s29, 1 }
  0x31   : > { %s398_s30 = sand.u32 1, %s2476_s27   ;;  %s2061_s17 = sshll.u32 %s2480_s28, 6 }
  0x32   : > { %p2662_p12 = por %p3074_p10, %p44_p1  ;;  %s2060_s11 = sshll.u32 %s398_s30, 2 }
  0x33   : > { %s2671_s25 = scalar_lea.hbm %s3042_s0, %s2061_s17  ;;  %s402_s18 = scalar_lea.vmem [#allocation2], %s2060_s11 }
  0x34   : > { %s409_s21 = sshll.u32 %s402_s18, 4  ;;  %p2673_p11 = pnand %p2235_p6, %p46_p8  ;;  %s2677_s21 = int_to_ptr.vmem [resolvable:$true] %s409_s21 }
  0x35   : > { %s399_s15 = scalar_lea.sflag [#allocation3], %s398_s30  ;;  %s2380_s13 = scalar_lea.hbm %s2671_s25, 64 }
  0x36   : > { %p2381_p13 = scmp.ne.s32.totalorder %s2671_s25, %s2380_s13  ;;  %p2382_p0 = pneg %p2673_p11 }
  0x37   : > { %s2385_s23 = scalar_lea.hbm %s3042_s0, 128  ;;  %p2386_p7 = scmp.lt.u32.totalorder %s2671_s25, %s3042_s0 }
  0x38   : > { %p2383_p3 = pnand %p2382_p0, %p2381_p13  ;;  %p2387_p9 = scmp.lt.u32.totalorder %s2385_s23, %s2380_s13 }
  0x39   : > { %p2389_p1 = scmp.lt.u32.totalorder %s2380_s13, %s2671_s25 }
  0x3a   : > { %p2384_p5 = pneg %p2383_p3  ;;  %p2388_p2 = por %p2387_p9, %p2386_p7 }
  0x3c   : > { %p2390_p4 = por %p2389_p1, %p2388_p2 }
  0x3e   : > { %p2391_p6 = pnand %p2390_p4, %p2384_p5 }
  0x40   : > { %2394 = shalt.err (!%p2391_p6)
}
  0x41   : > { %s2395_s30 = scalar_lea.vmem %s2677_s21, 64  ;;  %s2485_s18 = smov [#allocation2]  }
  0x42   : > { %p2396_p8 = scmp.ne.s32.totalorder %s2677_s21, %s2395_s30  ;;  %s2400_s10 = sshll.u32 %s2485_s18, 4  ;;  %s2401_s10 = int_to_ptr.vmem [resolvable:$false] %s2400_s10 }
  0x43   : > { %s2402_s11 = scalar_lea.vmem %s2401_s10, 128  ;;  %p2403_p3 = scmp.lt.s32.totalorder %s2677_s21, %s2401_s10 }
  0x44   : > { %p2398_p10 = pnand %p2396_p8, %p2382_p0  ;;  %p2404_p7 = scmp.lt.s32.totalorder %s2402_s11, %s2395_s30 }
  0x46   : > { %p2399_p13 = pneg %p2398_p10  ;;  %p2405_p9 = por %p2404_p7, %p2403_p3 }
  0x48   : > { %p2406_p2 = pnand %p2405_p9, %p2399_p13 }
  0x4a   : > { %2409 = shalt.err (!%p2406_p2)
}
  0x4b   : > { %2229 = dma.hbm_to_vmem [thread:$0]  (!%p2673_p11), %s2671_s25, 64, %s2677_s21, %s399_s15  }
  0x4c   : > { %p3077_p5 = scmp.ne.s32.totalorder %s3071_s16, 0 }
  0x4d   : > { %s2707_s13 = sand.u32 (!%p3077_p5), 1, %s2472_s26   ;;  %p3078_p0 = scmp.ne.s32.totalorder (!%p3077_p5), %s3068_s14, 0 }
  0x4e   : > { %418 = sbr.rel (%p3077_p5) target bundleno = 2732 (0xaac), region = 72  ;;  %s2063_s23 = sshll.u32 (!%p3077_p5), %s2707_s13, 2 }
  0x4f   : > { %s421_s17 = scalar_lea.sflag (!%p3077_p5), [#allocation3], %s2707_s13  ;;  %s424_s19 = scalar_lea.vmem (!%p3077_p5), [#allocation2], %s2063_s23 }
  0x55   : > { %2455 = dma.done.wait (%p3078_p0), %s421_s17, 64  }
  0x56   : > { %2457 = vsyncadd (%p3078_p0), %s421_s17, 4294967232  ;;  %p3079_p1 = scmp.eq.s32.totalorder %s2592_s29, 0 }
  0x58   : > { %2459 = dma.done.wait (%p3079_p1), [#allocation6], 192   ;;  %p3080_p11 = pmov %p3079_p1 }
  0x59   : > { %v2486_v0 = vmov 0.0   ;;  %vm2487_vm0 = vmmov 0   ;;  %v2302_v1 = vld [vmem:[#allocation5] sm:$0xff]   ;;  %vm489_vm1 = vcmask 1043456   ;;  %v2303_v2 = vld [vmem:[#allocation5 + $0x8] ss:$0 sps:$4 sm:$0xff]   ;;  %v649_v38 = vlaneseq }
  0x5a   : > { %2461 = vsyncadd (%p3080_p11), [#allocation6], 4294967104  ;;  %2134 = vmatprep.subr.bf16.mxu0 %v2486_v0  ;;  %2138 = vmatprep.mubr.msk.bf16.mxu0 %vm2487_vm0, %v2486_v0  ;;  %v491_v3 = vsel %vm489_vm1, %v2303_v2, 0  ;;  %vm485_vm2 = vcmask 195584   ;;  %v472_v4 = vld [vmem:[%s424_s19] sm:$0xf] }
  0x5b   : > { %2142 = vmatprep.subr.bf16.mxu1 %v2486_v0  ;;  %2146 = vmatprep.mubr.msk.bf16.mxu1 %vm2487_vm0, %v2486_v0  ;;  %vm535_vm3 = vcmask 261120   ;;  %v2304_v15 = vld [vmem:[%s3047_s5] sm:$0xff]   ;;  %v2305_v16 = vld [vmem:[%s3047_s5 + $0x8] sm:$0xff]   ;;  %s2488_s23 = smov 104   ;;  %s2489_s17 = smov 120   ;;  %v650_v42 = vshrl.u32 %v649_v38, 7 }
  0x5c   : > { %2135 = vmatpush3.bf16.msra.mxu0 %v2302_v1  ;;  %2143 = vmatpush3.bf16.msra.mxu1 %v2304_v15  ;;  %v2069_v21 = vld [vmem:[%s3045_s3] ss:$0 sm:$0xff]  ;;  %s2490_s19 = smov 112   ;;  %s2491_s25 = smov 32   ;;  %v2492_v36 = vmov 1983009808  }
  0x5d   : > { %2136 = vmatprep.subr.bf16.mxu0 %v2486_v0  ;;  %2144 = vmatprep.subr.bf16.mxu1 %v2486_v0  ;;  %v2070_v23 = vld [vmem:[%s3046_s4] ss:$0 sm:$0xff]  ;;  %v647_v37 = vunpack.c.l.s4 %v2492_v36  ;;  %v2493_v39 = vmov 1934713408   ;;  %v2494_v59 = vmov 0   ;;  %vm997_vm4 = vcmask 64512  }
  0x5e   : > { %v624_v27 = vld [vmem:[%s3048_s6] sm:$0xf]  ;;  %v664_v40 = vunpack.c.l.s4 %v2493_v39  ;;  %s2495_s16 = smov 96   ;;  %s2496_s21 = smov 16   ;;  %vm1779_vm5 = vcmask 130048  }
  0x5f   : > { %v625_v28 = vunpack.c.l.bf16 %v624_v27  ;;  %v2074_v35 = vld [vmem:[%s3049_s7] ss:$0 sm:$0xff]  ;;  %v648_v41 = vunpack.c.0.s8 %v647_v37  ;;  %s2497_s22 = smov 8   ;;  %s2498_s15 = smov 24  }
  0x60   : > { %2137 = vmatpush3.bf16.msra.mxu0 %v491_v3  ;;  %2145 = vmatpush3.bf16.msra.mxu1 %v2305_v16  ;;  %v665_v43 = vunpack.c.0.s8 %v664_v40  ;;  %s2065_s30 = sshll.u32 %s2707_s13, 4  ;;  %s2105_s11 = sshll.u32 %s2592_s29, 8 }
  0x61   : > { %2150 = vmatprep.subr.bf16.mxu0 %v2486_v0  ;;  %2156 = vmatprep.subr.bf16.mxu1 %v2486_v0  ;;  %v2762_v44 = vsub.s32 %v648_v41, %v650_v42  ;;  %v2306_v41 = vld [vmem:[%s3043_s1] sm:$0xff]   ;;  %s470_s18 = scalar_lea.vmem [#allocation7], %s2065_s30 }
  0x62   : > { %v2765_v48 = vsub.s32 %v665_v43, %v650_v42  ;;  %s1973_s10 = sshll.u32 %s470_s18, 4  ;;  %s2990_s10 = int_to_ptr.vmem [resolvable:$true] %s1973_s10 }
  0x63   : > { %2139 = vmatmul.mubr.msk.bf16.vlgmr.msra.gmra.mrb[0].mxu0 %vm485_vm2, %v472_v4  ;;  %s2410_s29 = scalar_lea.vmem %s2990_s10, 256 }
  0x64   : > { %2152 = vmatprep.mubr.msk.bf16.mxu0 %vm2487_vm0, %v2486_v0  ;;  %p2411_p4 = scmp.ne.s32.totalorder %s2990_s10, %s2410_s29 }
  0x66   : > { %p2412_p6 = pnand %p2411_p4, %p2662_p12 }
  0x68   : > { %p2413_p8 = pneg %p2412_p6 }
 0x136   : > { %v527_v5 = vpop.f32.mrb[0].mxu0 }
 0x137   : > { %v2140_v6 = vpop.f32.mrb[1].mxu0  ;;  %v536_v7 = vsel %vm535_vm3, %v527_v5, 0.0 }
 0x138   : > { %537 = vadd.xlane.f32.xlu0 %v536_v7  ;;  %v530_v8 = vpop.f32.mrb[2].mxu0 }
 0x139   : > { %v2141_v9 = vpop.f32.mrb[3].mxu0 }
 0x1c5   : > { %v538_v10 = vpop.xlane.xlu0 %537 }
 0x1c6   : > { %v540_v11 = vmul.f32 0.03125, %v538_v10 }
 0x1c8   : > { %v541_v12 = vsub.f32 %v527_v5, %v540_v11 }
 0x1ca   : > { %v542_v13 = vmul.f32 %v541_v12, %v541_v12 }
 0x1cc   : > { %v543_v14 = vsel %vm535_vm3, %v542_v13, 0.0 }
 0x1cd   : > { %544 = vadd.xlane.f32.xlu0 %v543_v14 }
 0x25a   : > { %v545_v17 = vpop.xlane.xlu0 %544 }
 0x25b   : > { %v546_v18 = vmul.f32 0.03125, %v545_v17 }
 0x25d   : > { %v547_v19 = vadd.f32 1e-06, %v546_v18 }
 0x25f   : > { %2314 = vrsqrt.f32 %v547_v19 }
 0x269   : > { %v2315_v20 = vpop.eup %2314 }
 0x26a   : > { %v549_v22 = vmul.f32 %v2315_v20, %v541_v12 }
 0x26c   : > { %v556_v24 = vmul.f32 %v2069_v21, %v549_v22 }
 0x26e   : > { %v563_v25 = vadd.f32 %v2070_v23, %v556_v24 }
 0x270   : > { %v564_v26 = vpack.c.bf16 %v563_v25, %v563_v25 }
 0x272   : > { %2147 = vmatmul.mubr.msk.bf16.vlgmr.msra.gmra.mrb[0].mxu1 %vm535_vm3, %v564_v26 }
 0x273   : > { %2158 = vmatprep.mubr.msk.bf16.mxu1 %vm2487_vm0, %v2486_v0 }
 0x345   : > { %v2753_v29 = vpop.f32.mrb[0].mxu1 }
 0x346   : > { %v626_v30 = vadd.f32 %v625_v28, %v2753_v29  ;;  %v2148_v31 = vpop.f32.mrb[1].mxu1 }
 0x347   : > { %v621_v32 = vpop.f32.mrb[2].mxu1 }
 0x348   : > { %v627_v33 = vpack.c.bf16 %v626_v30, %v626_v30  ;;  %v2149_v34 = vpop.f32.mrb[3].mxu1 }
 0x34a   : > { %644 = vrot.lane.b32.xlu0 %v627_v33, %s2488_s23  ;;  %640 = vrot.lane.b32.xlu1 %v627_v33, %s2489_s17  ;;  %v652_v55 = vrot.slane %v627_v33, %v2762_v44 }
 0x34e   : > { %642 = vrot.lane.b32.xlu1 %v627_v33, %s2490_s19 }
 0x352   : > { %634 = vrot.lane.b32.xlu1 %v2074_v35, %s2491_s25  ;;  %s2499_s25 = smov [#allocation7]  }
 0x3bc   : > { %v645_v45 = vpop.permute.xlu0 %644  ;;  %v641_v46 = vpop.permute.xlu1 %640 }
 0x3bd   : > { %v694_v47 = vrot.slane %v645_v45, %v2762_v44  ;;  %v686_v49 = vrot.slane %v641_v46, %v2762_v44  ;;  %v2307_v45 = vld [vmem:[%s3043_s1 + $0x8] sm:$0xff]  }
 0x3bf   : > { %v695_v50 = vcombine.low %v686_v49, %v694_v47  ;;  %v696_v51 = vcombine.high %v686_v49, %v694_v47 }
 0x3c0   : > { %v643_v52 = vpop.permute.xlu1 %642 }
 0x3c1   : > { %v703_v53 = vrot.slane %v695_v50, %v2765_v48  ;;  %v660_v54 = vrot.slane %v643_v52, %v2762_v44  ;;  %v710_v56 = vrot.slane %v696_v51, %v2765_v48  ;;  %v2308_v50 = vld [vmem:[%s3043_s1 + $0x10] sm:$0xff]   ;;  %v2309_v51 = vld [vmem:[%s3043_s1 + $0x18] sm:$0xff]  }
 0x3c3   : > { %v661_v57 = vcombine.low %v652_v55, %v660_v54  ;;  %v662_v58 = vcombine.high %v652_v55, %v660_v54  ;;  %v711_v60 = vcombine.high %v703_v53, %v2494_v59  ;;  %v712_v63 = vcombine.high %v710_v56, %v2494_v59 }
 0x3c4   : > { %v718_v1 = vshrl.u32 %v703_v53, 16  ;;  %v734_v7 = vshrl.u32 %v710_v56, 16 }
 0x3c5   : > { %v669_v61 = vrot.slane %v661_v57, %v2765_v48  ;;  %v676_v62 = vrot.slane %v662_v58, %v2765_v48  ;;  %v726_v6 = vshrl.u32 %v711_v60, 16  ;;  %v742_v14 = vshrl.u32 %v712_v63, 16 }
 0x3c7   : > { %v677_v2 = vcombine.high %v669_v61, %v2494_v59  ;;  %v678_v3 = vcombine.high %v676_v62, %v2494_v59  ;;  %v715_v4 = vpack.i.b16 %v703_v53, %v669_v61  ;;  %v717_v5 = vshrl.u32 %v669_v61, 16 }
 0x3c8   : > { %v731_v8 = vpack.i.b16 %v710_v56, %v676_v62  ;;  %v733_v9 = vshrl.u32 %v676_v62, 16 }
 0x3c9   : > { %v719_v10 = vpack.i.b16 %v718_v1, %v717_v5  ;;  %v723_v11 = vpack.i.b16 %v711_v60, %v677_v2  ;;  %v725_v12 = vshrl.u32 %v677_v2, 16  ;;  %v739_v13 = vpack.i.b16 %v712_v63, %v678_v3 }
 0x3ca   : > { %v735_v15 = vpack.i.b16 %v734_v7, %v733_v9  ;;  %v741_v16 = vshrl.u32 %v678_v3, 16  ;;  %v745_v17 = vcombine.low %v715_v4, %v731_v8 }
 0x3cb   : > { %v727_v18 = vpack.i.b16 %v726_v6, %v725_v12  ;;  %v753_v19 = vcombine.low %v723_v11, %v739_v13  ;;  %v635_v13 = vpop.permute.xlu1 %634 }
 0x3cc   : > { %v743_v20 = vpack.i.b16 %v742_v14, %v741_v16  ;;  %v770_v21 = vcombine.low %v719_v10, %v735_v15  ;;  %v752_v22 = vrot.slane %v745_v17, %v2762_v44  ;;  %v637_v14 = vadd.f32 %v635_v13, %v2753_v29 }
 0x3cd   : > { %v760_v23 = vrot.slane %v753_v19, %v2762_v44 }
 0x3ce   : > { %v778_v24 = vcombine.low %v727_v18, %v743_v20  ;;  %v777_v26 = vrot.slane %v770_v21, %v2762_v44  ;;  %v638_v15 = vpack.c.bf16 %v637_v14, %v637_v14 }
 0x3cf   : > { %v761_v25 = vcombine.low %v752_v22, %v760_v23 }
 0x3d0   : > { %v785_v27 = vrot.slane %v778_v24, %v2762_v44 }
 0x3d1   : > { %v768_v28 = vrot.slane %v761_v25, %v2765_v48 }
 0x3d2   : > { %v786_v30 = vcombine.low %v777_v26, %v785_v27 }
 0x3d3   : > { %v798_v33 = vshrl.u32 %v768_v28, 16  ;;  %v769_v38 = vcombine.high %v768_v28, %v2494_v59 }
 0x3d4   : > { %v793_v31 = vrot.slane %v786_v30, %v2765_v48 }
 0x3d5   : > { %v804_v43 = vshrl.u32 %v769_v38, 16 }
 0x3d6   : > { %v797_v32 = vpack.i.b16 %v793_v31, %v768_v28  ;;  %v799_v34 = vshrl.u32 %v793_v31, 16  ;;  %v794_v35 = vcombine.high %v793_v31, %v2494_v59 }
 0x3d8   : > { %v1002_v36 = vsel %vm997_vm4, %v797_v32, 0  ;;  %v800_v37 = vpack.i.b16 %v799_v34, %v798_v33  ;;  %v805_v40 = vshrl.u32 %v794_v35, 16  ;;  %v803_v42 = vpack.i.b16 %v794_v35, %v769_v38 }
 0x3d9   : > { %2151 = vmatpush3.bf16.xpose.msra.mxu0 %v1002_v36 }
 0x3da   : > { %v1054_v39 = vsel %vm997_vm4, %v800_v37, 0  ;;  %2162 = vmatprep.subr.bf16.mxu0 %v2486_v0  ;;  %v806_v46 = vpack.i.b16 %v805_v40, %v804_v43  ;;  %v1106_v47 = vsel %vm997_vm4, %v803_v42, 0 }
 0x3db   : > { %2157 = vmatpush3.bf16.xpose.msra.mxu1 %v1054_v39 }
 0x3dc   : > { %2168 = vmatprep.subr.bf16.mxu1 %v2486_v0  ;;  %v1158_v49 = vsel %vm997_vm4, %v806_v46, 0 }
 0x3e0   : > { %2153 = vmatmul.mubr.msk.bf16.vlgmr.msra.gmra.mrb[4].mxu0 %vm997_vm4, %v2306_v41 }
 0x3e1   : > { %2163 = vmatpush3.bf16.xpose.msra.mxu0 %v1106_v47  ;;  %2164 = vmatprep.mubr.msk.bf16.mxu0 %vm2487_vm0, %v2486_v0 }
 0x3e2   : > { %2159 = vmatmul.mubr.msk.bf16.vlgmr.msra.gmra.mrb[4].mxu1 %vm997_vm4, %v2307_v45  ;;  %2174 = vmatprep.subr.bf16.mxu0 %v2486_v0 }
 0x3e3   : > { %2169 = vmatpush3.bf16.xpose.msra.mxu1 %v1158_v49  ;;  %2170 = vmatprep.mubr.msk.bf16.mxu1 %vm2487_vm0, %v2486_v0 }
 0x3e4   : > { %2180 = vmatprep.subr.bf16.mxu1 %v2486_v0 }
 0x3e8   : > { %2165 = vmatmul.mubr.msk.bf16.vlgmr.msra.gmra.mrb[8].mxu0 %vm997_vm4, %v2308_v50 }
 0x3e9   : > { %2176 = vmatprep.mubr.msk.bf16.mxu0 %vm2487_vm0, %v2486_v0 }
 0x3ea   : > { %2171 = vmatmul.mubr.msk.bf16.vlgmr.msra.gmra.mrb[8].mxu1 %vm997_vm4, %v2309_v51 }
 0x3eb   : > { %2182 = vmatprep.mubr.msk.bf16.mxu1 %vm2487_vm0, %v2486_v0 }
 0x4b3   : > { %v1038_v52 = vpop.f32.mrb[4].mxu0 }
 0x4b4   : > { %v2154_v53 = vpop.f32.mrb[5].mxu0  ;;  %v1201_v54 = vsel %vm997_vm4, %v1038_v52, -inf }
 0x4b5   : > { %v1090_v55 = vpop.f32.mrb[4].mxu1  ;;  %1202 = vmax.xlane.f32.xlu1 %v1201_v54  ;;  %v1041_v56 = vpop.f32.mrb[6].mxu0 }
 0x4b6   : > { %v2155_v57 = vpop.f32.mrb[7].mxu0  ;;  %v2160_v58 = vpop.f32.mrb[5].mxu1  ;;  %v1204_v60 = vsel %vm997_vm4, %v1041_v56, -inf  ;;  %v1207_v61 = vsel %vm997_vm4, %v1090_v55, -inf }
 0x4b7   : > { %v1093_v62 = vpop.f32.mrb[6].mxu1  ;;  %1205 = vmax.xlane.f32.xlu0 %v1204_v60 }
 0x4b8   : > { %v2161_v63 = vpop.f32.mrb[7].mxu1  ;;  %v1210_v2 = vsel %vm997_vm4, %v1093_v62, -inf }
 0x4b9   : > { %1208 = vmax.xlane.f32.xlu1 %v1207_v61 }
 0x4bb   : > { %v1142_v1 = vpop.f32.mrb[8].mxu0 }
 0x4bc   : > { %v2166_v3 = vpop.f32.mrb[9].mxu0  ;;  %v1213_v8 = vsel %vm997_vm4, %v1142_v1, -inf }
 0x4bd   : > { %v1194_v4 = vpop.f32.mrb[8].mxu1  ;;  %1211 = vmax.xlane.f32.xlu1 %v1210_v2  ;;  %v2822_v5 = vpop.f32.mrb[10].mxu0 }
 0x4be   : > { %v1219_v6 = vsel %vm997_vm4, %v1194_v4, -inf  ;;  %v2167_v7 = vpop.f32.mrb[11].mxu0  ;;  %v2172_v9 = vpop.f32.mrb[9].mxu1  ;;  %v1216_v12 = vsel %vm997_vm4, %v2822_v5, -inf }
 0x4bf   : > { %1220 = vmax.xlane.f32.xlu0 %v1219_v6  ;;  %v2826_v10 = vpop.f32.mrb[10].mxu1 }
 0x4c0   : > { %v2173_v11 = vpop.f32.mrb[11].mxu1  ;;  %v1222_v16 = vsel %vm997_vm4, %v2826_v10, -inf }
 0x4c1   : > { %1214 = vmax.xlane.f32.xlu1 %v1213_v8 }
 0x4c5   : > { %1217 = vmax.xlane.f32.xlu1 %v1216_v12 }
 0x4d5   : > { %808 = vrot.lane.b32.xlu0 %v638_v15, %s2489_s17 }
 0x4d6   : > { %810 = vrot.lane.b32.xlu1 %v638_v15, %s2490_s19  ;;  %s3081_s19 = sld [smem:[#allocation14_spill]] }
 0x4da   : > { %812 = vrot.lane.b32.xlu1 %v638_v15, %s2488_s23  ;;  %s3083_s23 = sld [smem:[#allocation16_spill]] }
 0x4de   : > { %814 = vrot.lane.b32.xlu1 %v638_v15, %s2495_s16 }
 0x4e0   : > { %s2996_s17 = scalar_lea.hbm %s3083_s23, %s2105_s11 }
 0x502   : > { %1223 = vmax.xlane.f32.xlu1 %v1222_v16 }
 0x542   : > { %v1203_v17 = vpop.xlane.xlu1 %1202 }
 0x543   : > { %v1225_v26 = vsub.f32 %v1038_v52, %v1203_v17 }
 0x544   : > { %v1206_v19 = vpop.xlane.xlu0 %1205 }
 0x545   : > { %v1233_v27 = vmul.f32 1.442695, %v1225_v26  ;;  %v1226_v32 = vsub.f32 %v1041_v56, %v1206_v19 }
 0x546   : > { %v1209_v18 = vpop.xlane.xlu1 %1208 }
 0x547   : > { %v1227_v28 = vsub.f32 %v1090_v55, %v1209_v18  ;;  %2316 = vpow2.f32 %v1233_v27  ;;  %v1235_v35 = vmul.f32 1.442695, %v1226_v32 }
 0x549   : > { %v1237_v30 = vmul.f32 1.442695, %v1227_v28 }
 0x54a   : > { %v1212_v20 = vpop.xlane.xlu1 %1211 }
 0x54b   : > { %v1228_v31 = vsub.f32 %v1093_v62, %v1212_v20  ;;  %2318 = vpow2.f32 %v1237_v30 }
 0x54c   : > { %v1221_v21 = vpop.xlane.xlu0 %1220 }
 0x54d   : > { %v1239_v33 = vmul.f32 1.442695, %v1228_v31  ;;  %v1231_v36 = vsub.f32 %v1194_v4, %v1221_v21 }
 0x54e   : > { %v1215_v29 = vpop.xlane.xlu1 %1214 }
 0x54f   : > { %v1229_v34 = vsub.f32 %v1142_v1, %v1215_v29  ;;  %2320 = vpow2.f32 %v1239_v33  ;;  %v1245_v39 = vmul.f32 1.442695, %v1231_v36 }
 0x550   : > { %v809_v22 = vpop.permute.xlu0 %808  ;;  %2322 = vpow2.f32 %v1235_v35 }
 0x551   : > { %816 = vrot.lane.b32.xlu0 %v809_v22, %s2495_s16  ;;  %v1241_v37 = vmul.f32 1.442695, %v1229_v34  ;;  %v2840_v38 = vpop.eup %2316 }
 0x552   : > { %v1218_v23 = vpop.xlane.xlu1 %1217  ;;  %v1249_v40 = vsel %vm997_vm4, %v2840_v38, 0.0 }
 0x553   : > { %v1230_v24 = vsub.f32 %v2822_v5, %v1218_v23  ;;  %2324 = vpow2.f32 %v1241_v37 }
 0x554   : > { %2326 = vpow2.f32 %v1245_v39 }
 0x555   : > { %v2844_v41 = vpop.eup %2318  ;;  %v1243_v60 = vmul.f32 1.442695, %v1230_v24 }
 0x556   : > { %v811_v25 = vpop.permute.xlu1 %810  ;;  %v1255_v42 = vsel %vm997_vm4, %v2844_v41, 0.0 }
 0x557   : > { %818 = vrot.lane.b32.xlu1 %v811_v25, %s2495_s16 }
 0x559   : > { %v2848_v43 = vpop.eup %2320 }
 0x55a   : > { %v2850_v45 = vpop.eup %2322  ;;  %v1258_v46 = vsel %vm997_vm4, %v2848_v43, 0.0  ;;  %v813_v53 = vpop.permute.xlu1 %812 }
 0x55b   : > { %v1252_v49 = vsel %vm997_vm4, %v2850_v45, 0.0 }
 0x55d   : > { %v2854_v47 = vpop.eup %2324 }
 0x55e   : > { %v1261_v50 = vsel %vm997_vm4, %v2854_v47, 0.0  ;;  %v2860_v51 = vpop.eup %2326  ;;  %v815_v54 = vpop.permute.xlu1 %814 }
 0x55f   : > { %v1267_v52 = vsel %vm997_vm4, %v2860_v51, 0.0  ;;  %v829_v4 = vrot.slane %v815_v54, %v2762_v44 }
 0x570   : > { %1250 = vadd.xlane.f32.xlu0 %v1249_v40 }
 0x574   : > { %1256 = vadd.xlane.f32.xlu0 %v1255_v42 }
 0x578   : > { %1259 = vadd.xlane.f32.xlu0 %v1258_v46 }
 0x57b   : > { %1253 = vadd.xlane.f32.xlu1 %v1252_v49 }
 0x57c   : > { %1262 = vadd.xlane.f32.xlu0 %v1261_v50 }
 0x580   : > { %1268 = vadd.xlane.f32.xlu0 %v1267_v52 }
 0x58c   : > { %820 = vrot.lane.b32.xlu1 %v813_v53, %s2495_s16 }
 0x58f   : > { %v1224_v55 = vpop.xlane.xlu1 %1223 }
 0x590   : > { %v1232_v56 = vsub.f32 %v2826_v10, %v1224_v55 }
 0x592   : > { %v1247_v57 = vmul.f32 1.442695, %v1232_v56 }
 0x594   : > { %2328 = vpow2.f32 %v1247_v57 }
 0x595   : > { %2330 = vpow2.f32 %v1243_v60 }
 0x59e   : > { %v2866_v58 = vpop.eup %2328 }
 0x59f   : > { %v1270_v61 = vsel %vm997_vm4, %v2866_v58, 0.0  ;;  %v2870_v62 = vpop.eup %2330 }
 0x5a0   : > { %1271 = vadd.xlane.f32.xlu0 %v1270_v61  ;;  %v1264_v63 = vsel %vm997_vm4, %v2870_v62, 0.0 }
 0x5b0   : > { %1265 = vadd.xlane.f32.xlu1 %v1264_v63 }
 0x5c3   : > { %v817_v2 = vpop.permute.xlu0 %816 }
 0x5c4   : > { %v863_v13 = vrot.slane %v817_v2, %v2762_v44 }
 0x5c9   : > { %v819_v1 = vpop.permute.xlu1 %818 }
 0x5ca   : > { %v837_v3 = vrot.slane %v819_v1, %v2762_v44 }
 0x5cc   : > { %v838_v5 = vcombine.low %v829_v4, %v837_v3  ;;  %v839_v7 = vcombine.high %v829_v4, %v837_v3 }
 0x5ce   : > { %v846_v9 = vrot.slane %v838_v5, %v2765_v48  ;;  %v853_v10 = vrot.slane %v839_v7, %v2765_v48 }
 0x5d0   : > { %v854_v15 = vcombine.high %v846_v9, %v2494_v59  ;;  %v855_v18 = vcombine.high %v853_v10, %v2494_v59  ;;  %v894_v21 = vshrl.u32 %v846_v9, 16  ;;  %v910_v22 = vshrl.u32 %v853_v10, 16 }
 0x5d2   : > { %v902_v29 = vshrl.u32 %v854_v15, 16  ;;  %v918_v28 = vshrl.u32 %v855_v18, 16 }
 0x5fd   : > { %v1251_v6 = vpop.xlane.xlu0 %1250 }
 0x5fe   : > { %2332 = vrcp.f32 %v1251_v6 }
 0x601   : > { %v1257_v11 = vpop.xlane.xlu0 %1256 }
 0x605   : > { %v1260_v23 = vpop.xlane.xlu0 %1259 }
 0x608   : > { %v1254_v8 = vpop.xlane.xlu1 %1253  ;;  %v2333_v54 = vpop.eup %2332 }
 0x609   : > { %2334 = vrcp.f32 %v1254_v8 }
 0x60a   : > { %2336 = vrcp.f32 %v1260_v23 }
 0x60b   : > { %2338 = vrcp.f32 %v1257_v11 }
 0x60c   : > { %v821_v12 = vpop.permute.xlu1 %820 }
 0x60d   : > { %v871_v14 = vrot.slane %v821_v12, %v2762_v44  ;;  %v1263_v12 = vpop.xlane.xlu0 %1262 }
 0x60f   : > { %v872_v16 = vcombine.low %v863_v13, %v871_v14  ;;  %v873_v17 = vcombine.high %v863_v13, %v871_v14 }
 0x611   : > { %v880_v19 = vrot.slane %v872_v16, %v2765_v48  ;;  %v887_v20 = vrot.slane %v873_v17, %v2765_v48 }
 0x613   : > { %v888_v24 = vcombine.high %v880_v19, %v2494_v59  ;;  %v889_v25 = vcombine.high %v887_v20, %v2494_v59  ;;  %v892_v26 = vpack.i.b16 %v880_v19, %v846_v9  ;;  %v895_v27 = vshrl.u32 %v880_v19, 16  ;;  %v2335_v60 = vpop.eup %2334 }
 0x614   : > { %v908_v30 = vpack.i.b16 %v887_v20, %v853_v10  ;;  %v911_v31 = vshrl.u32 %v887_v20, 16  ;;  %v2337_v1 = vpop.eup %2336  ;;  %v1282_v4 = vmul.f32 %v2335_v60, %v2850_v45  ;;  %v1281_v10 = vmul.f32 %v2333_v54, %v2840_v38  ;;  %v1269_v20 = vpop.xlane.xlu0 %1268 }
 0x615   : > { %v896_v32 = vpack.i.b16 %v895_v27, %v894_v21  ;;  %v900_v33 = vpack.i.b16 %v888_v24, %v854_v15  ;;  %v903_v34 = vshrl.u32 %v888_v24, 16  ;;  %v916_v36 = vpack.i.b16 %v889_v25, %v855_v18  ;;  %v2339_v9 = vpop.eup %2338 }
 0x616   : > { %v912_v35 = vpack.i.b16 %v911_v31, %v910_v22  ;;  %v919_v37 = vshrl.u32 %v889_v25, 16  ;;  %v922_v39 = vcombine.low %v892_v26, %v908_v30  ;;  %v1284_v11 = vmul.f32 %v2337_v1, %v2848_v43 }
 0x617   : > { %v904_v40 = vpack.i.b16 %v903_v34, %v902_v29  ;;  %v930_v46 = vcombine.low %v900_v33, %v916_v36  ;;  %v1283_v45 = vmul.f32 %v2339_v9, %v2844_v41  ;;  %v1289_v19 = vpack.c.bf16 %v1282_v4, %v1281_v10 }
 0x618   : > { %v920_v42 = vpack.i.b16 %v919_v37, %v918_v28  ;;  %v947_v49 = vcombine.low %v896_v32, %v912_v35  ;;  %v929_v50 = vrot.slane %v922_v39, %v2762_v44  ;;  %2340 = vrcp.f32 %v1269_v20 }
 0x619   : > { %v937_v53 = vrot.slane %v930_v46, %v2762_v44  ;;  %v1290_v43 = vpack.c.bf16 %v1284_v11, %v1283_v45 }
 0x61a   : > { %v955_v52 = vcombine.low %v904_v40, %v920_v42  ;;  %v954_v56 = vrot.slane %v947_v49, %v2762_v44 }
 0x61b   : > { %v938_v55 = vcombine.low %v929_v50, %v937_v53 }
 0x61c   : > { %v962_v57 = vrot.slane %v955_v52, %v2762_v44 }
 0x61d   : > { %v945_v61 = vrot.slane %v938_v55, %v2765_v48 }
 0x61e   : > { %v963_v63 = vcombine.low %v954_v56, %v962_v57 }
 0x61f   : > { %v946_v3 = vcombine.high %v945_v61, %v2494_v59  ;;  %v975_v6 = vshrl.u32 %v945_v61, 16 }
 0x620   : > { %v970_v2 = vrot.slane %v963_v63, %v2765_v48 }
 0x621   : > { %v981_v13 = vshrl.u32 %v946_v3, 16 }
 0x622   : > { %v974_v5 = vpack.i.b16 %v970_v2, %v945_v61  ;;  %v976_v7 = vshrl.u32 %v970_v2, 16  ;;  %v971_v8 = vcombine.high %v970_v2, %v2494_v59  ;;  %v2341_v29 = vpop.eup %2340 }
 0x623   : > { %v1287_v23 = vmul.f32 %v2341_v29, %v2860_v51 }
 0x624   : > { %v1297_v14 = vsel %vm489_vm1, %v974_v5, 0  ;;  %v977_v15 = vpack.i.b16 %v976_v7, %v975_v6  ;;  %v980_v16 = vpack.i.b16 %v971_v8, %v946_v3  ;;  %v982_v17 = vshrl.u32 %v971_v8, 16 }
 0x625   : > { %2175 = vmatpush3.bf16.msra.mxu0 %v1297_v14 }
 0x626   : > { %v1344_v18 = vsel %vm489_vm1, %v977_v15, 0  ;;  %2186 = vmatprep.subr.bf16.mxu0 %v2486_v0  ;;  %v983_v59 = vpack.i.b16 %v982_v17, %v981_v13  ;;  %v1391_v38 = vsel %vm489_vm1, %v980_v16, 0 }
 0x627   : > { %2181 = vmatpush3.bf16.msra.mxu1 %v1344_v18 }
 0x628   : > { %2177 = vmatmul.mubr.msk.bf16.vlgmr.msra.gmra.mrb[12].mxu0 %vm997_vm4, %v1289_v19  ;;  %2192 = vmatprep.subr.bf16.mxu1 %v2486_v0  ;;  %v1438_v41 = vsel %vm489_vm1, %v983_v59, 0 }
 0x629   : > { %2187 = vmatpush3.bf16.msra.mxu0 %v1391_v38  ;;  %2188 = vmatprep.mubr.msk.bf16.mxu0 %vm2487_vm0, %v2486_v0 }
 0x62a   : > { %2183 = vmatmul.mubr.msk.bf16.vlgmr.msra.gmra.mrb[12].mxu1 %vm997_vm4, %v1290_v43  ;;  %2198 = vmatprep.subr.bf16.mxu0 %v2486_v0 }
 0x62b   : > { %2193 = vmatpush3.bf16.msra.mxu1 %v1438_v41  ;;  %2194 = vmatprep.mubr.msk.bf16.mxu1 %vm2487_vm0, %v2486_v0 }
 0x62c   : > { %2206 = vmatprep.subr.bf16.mxu1 %v2486_v0 }
 0x62d   : > { %v1272_v21 = vpop.xlane.xlu0 %1271 }
 0x62e   : > { %2342 = vrcp.f32 %v1272_v21 }
 0x62f   : > { %2344 = vrcp.f32 %v1263_v12 }
 0x638   : > { %v2343_v22 = vpop.eup %2342 }
 0x639   : > { %v1288_v24 = vmul.f32 %v2343_v22, %v2866_v58  ;;  %v2345_v27 = vpop.eup %2344 }
 0x63a   : > { %v1285_v30 = vmul.f32 %v2345_v27, %v2854_v47  ;;  %v2310_v27 = vld [vmem:[%s3050_s8] sm:$0xff]  }
 0x63b   : > { %v1292_v25 = vpack.c.bf16 %v1288_v24, %v1287_v23 }
 0x63d   : > { %2195 = vmatmul.mubr.msk.bf16.vlgmr.msra.gmra.mrb[16].mxu1 %vm997_vm4, %v1292_v25  ;;  %v1266_v26 = vpop.xlane.xlu1 %1265 }
 0x63e   : > { %2346 = vrcp.f32 %v1266_v26  ;;  %2210 = vmatprep.mubr.msk.bf16.mxu1 %vm2487_vm0, %v2486_v0 }
 0x648   : > { %v2347_v28 = vpop.eup %2346 }
 0x649   : > { %v1286_v31 = vmul.f32 %v2347_v28, %v2870_v62 }
 0x64b   : > { %v1291_v32 = vpack.c.bf16 %v1286_v31, %v1285_v30 }
 0x64d   : > { %2189 = vmatmul.mubr.msk.bf16.vlgmr.msra.gmra.mrb[16].mxu0 %vm997_vm4, %v1291_v32 }
 0x64e   : > { %2202 = vmatprep.mubr.msk.bf16.mxu0 %vm2487_vm0, %v2486_v0  ;;  %2199 = vmatpush3.bf16.msra.mxu0 %v2310_v27 }
 0x64f   : > { %2200 = vmatprep.subr.bf16.mxu0 %v2486_v0 }
 0x6fb   : > { %v1333_v51 = vpop.f32.mrb[12].mxu0 }
 0x6fc   : > { %v2178_v58 = vpop.f32.mrb[13].mxu0 }
 0x6fd   : > { %v1336_v33 = vpop.f32.mrb[14].mxu0  ;;  %v1380_v34 = vpop.f32.mrb[12].mxu1 }
 0x6fe   : > { %v2179_v35 = vpop.f32.mrb[15].mxu0  ;;  %v2184_v36 = vpop.f32.mrb[13].mxu1 }
 0x6ff   : > { %v1383_v37 = vpop.f32.mrb[14].mxu1 }
 0x700   : > { %v2185_v39 = vpop.f32.mrb[15].mxu1 }
 0x710   : > { %v1474_v40 = vpop.f32.mrb[16].mxu1 }
 0x711   : > { %v1497_v42 = vcombine.low %v1380_v34, %v1474_v40  ;;  %v1498_v46 = vcombine.high %v1380_v34, %v1474_v40  ;;  %v2196_v47 = vpop.f32.mrb[17].mxu1 }
 0x712   : > { %v1477_v49 = vpop.f32.mrb[18].mxu1 }
 0x713   : > { %v1565_v62 = vcombine.low %v1383_v37, %v1477_v49  ;;  %v1566_v50 = vcombine.high %v1383_v37, %v1477_v49  ;;  %v2197_v52 = vpop.f32.mrb[19].mxu1  ;;  %v1505_v57 = vrot.slane %v1497_v42, %v2762_v44  ;;  %v1512_v60 = vrot.slane %v1498_v46, %v2762_v44  ;;  %v2311_v49 = vld [vmem:[%s3050_s8 + $0x8] sm:$0xff]  }
 0x714   : > { %2201 = vmatpush3.bf16.msra.mxu0 %v2311_v49 }
 0x715   : > { %v1573_v9 = vrot.slane %v1565_v62, %v2762_v44  ;;  %v1580_v10 = vrot.slane %v1566_v50, %v2762_v44 }
 0x720   : > { %v1427_v53 = vpop.f32.mrb[16].mxu0 }
 0x721   : > { %v1481_v54 = vcombine.low %v1333_v51, %v1427_v53  ;;  %v1482_v55 = vcombine.high %v1333_v51, %v1427_v53  ;;  %v2190_v56 = vpop.f32.mrb[17].mxu0 }
 0x722   : > { %v1430_v61 = vpop.f32.mrb[18].mxu0 }
 0x723   : > { %v1489_v63 = vrot.slane %v1481_v54, %v2762_v44  ;;  %v1496_v1 = vrot.slane %v1482_v55, %v2762_v44  ;;  %v1549_v2 = vcombine.low %v1336_v33, %v1430_v61  ;;  %v1550_v3 = vcombine.high %v1336_v33, %v1430_v61  ;;  %v2191_v4 = vpop.f32.mrb[19].mxu0 }
 0x725   : > { %v1513_v5 = vcombine.low %v1489_v63, %v1505_v57  ;;  %v1514_v6 = vcombine.high %v1489_v63, %v1505_v57  ;;  %v1529_v7 = vcombine.low %v1496_v1, %v1512_v60  ;;  %v1530_v8 = vcombine.high %v1496_v1, %v1512_v60 }
 0x726   : > { %v1557_v11 = vrot.slane %v1549_v2, %v2762_v44  ;;  %v1564_v12 = vrot.slane %v1550_v3, %v2762_v44 }
 0x727   : > { %v1521_v13 = vrot.slane %v1513_v5, %v2765_v48  ;;  %v1528_v14 = vrot.slane %v1514_v6, %v2765_v48  ;;  %v1537_v15 = vrot.slane %v1529_v7, %v2765_v48  ;;  %v1544_v16 = vrot.slane %v1530_v8, %v2765_v48 }
 0x728   : > { %v1581_v17 = vcombine.low %v1557_v11, %v1573_v9  ;;  %v1582_v45 = vcombine.high %v1557_v11, %v1573_v9  ;;  %v1597_v18 = vcombine.low %v1564_v12, %v1580_v10  ;;  %v1598_v19 = vcombine.high %v1564_v12, %v1580_v10 }
 0x729   : > { %v1617_v59 = vcombine.low %v1521_v13, %v1528_v14  ;;  %v2087_v38 = vcombine.high %v1521_v13, %v1528_v14  ;;  %v1633_v43 = vcombine.low %v1537_v15, %v1544_v16  ;;  %v2088_v20 = vcombine.high %v1537_v15, %v1544_v16 }
 0x72a   : > { %v1589_v41 = vrot.slane %v1581_v17, %v2765_v48  ;;  %v1596_v21 = vrot.slane %v1582_v45, %v2765_v48  ;;  %v1605_v29 = vrot.slane %v1597_v18, %v2765_v48  ;;  %v1612_v22 = vrot.slane %v1598_v19, %v2765_v48 }
 0x72b   : > { %v1624_v23 = vrot.slane %v1617_v59, %v2762_v44  ;;  %v1632_v24 = vrot.slane %v2087_v38, %v2762_v44  ;;  %v1640_v25 = vrot.slane %v1633_v43, %v2762_v44  ;;  %v1648_v26 = vrot.slane %v2088_v20, %v2762_v44  ;;  %v2091_v43 = vld [vmem:[%s3051_s9] ss:$0 sm:$0xff] }
 0x72c   : > { %v1685_v28 = vcombine.low %v1589_v41, %v1596_v21  ;;  %v2089_v30 = vcombine.high %v1589_v41, %v1596_v21  ;;  %v1701_v31 = vcombine.low %v1605_v29, %v1612_v22  ;;  %v2090_v32 = vcombine.high %v1605_v29, %v1612_v22 }
 0x72d   : > { %v1650_v51 = vcombine.high %v1624_v23, %v1632_v24  ;;  %v1666_v58 = vcombine.high %v1640_v25, %v1648_v26  ;;  %v1649_v33 = vcombine.low %v1624_v23, %v1632_v24  ;;  %v1665_v34 = vcombine.low %v1640_v25, %v1648_v26 }
 0x72e   : > { %v1692_v35 = vrot.slane %v1685_v28, %v2762_v44  ;;  %v1700_v36 = vrot.slane %v2089_v30, %v2762_v44  ;;  %v1708_v37 = vrot.slane %v1701_v31, %v2762_v44  ;;  %v1716_v39 = vrot.slane %v2090_v32, %v2762_v44 }
 0x72f   : > { %v1664_v40 = vrot.slane %v1650_v51, %v2765_v48  ;;  %v1680_v42 = vrot.slane %v1666_v58, %v2765_v48  ;;  %v1657_v46 = vrot.slane %v1649_v33, %v2765_v48  ;;  %v1673_v47 = vrot.slane %v1665_v34, %v2765_v48 }
 0x730   : > { %v1718_v62 = vcombine.high %v1692_v35, %v1700_v36  ;;  %v1734_v50 = vcombine.high %v1708_v37, %v1716_v39  ;;  %v1717_v52 = vcombine.low %v1692_v35, %v1700_v36  ;;  %v1733_v53 = vcombine.low %v1708_v37, %v1716_v39  ;;  %v2312_v35 = vld [vmem:[%s3054_s12] sm:$0xff]   ;;  %v2313_v36 = vld [vmem:[%s3054_s12 + $0x8] sm:$0xff]  }
 0x731   : > { %v1683_v54 = vcombine.low %v1664_v40, %v1680_v42  ;;  %v1681_v44 = vcombine.low %v1657_v46, %v1673_v47  ;;  %v1682_v55 = vcombine.high %v1657_v46, %v1673_v47  ;;  %v1684_v56 = vcombine.high %v1664_v40, %v1680_v42  ;;  %2207 = vmatpush3.bf16.msra.mxu1 %v2312_v35 }
 0x732   : > { %v1732_v57 = vrot.slane %v1718_v62, %v2765_v48  ;;  %v1748_v60 = vrot.slane %v1734_v50, %v2765_v48  ;;  %v1725_v61 = vrot.slane %v1717_v52, %v2765_v48  ;;  %v1741_v63 = vrot.slane %v1733_v53, %v2765_v48  ;;  %2208 = vmatprep.subr.bf16.mxu1 %v2486_v0  ;;  %v2095_v0 = vld [vmem:[%s3081_s19] ss:$0 sm:$0xff]  ;;  %s1960_s19 = scalar_lea.sflag [#allocation4], %s2707_s13 }
 0x734   : > { %v1751_v1 = vcombine.low %v1732_v57, %v1748_v60  ;;  %v1750_v2 = vcombine.high %v1725_v61, %v1741_v63  ;;  %v1749_v3 = vcombine.low %v1725_v61, %v1741_v63  ;;  %v1752_v4 = vcombine.high %v1732_v57, %v1748_v60 }
 0x735   : > { %2209 = vmatpush3.bf16.msra.mxu1 %v2313_v36 }
 0x736   : > { %v2292_v5 = vpack.i.bf16 %v1751_v1, %v1683_v54  ;;  %v2287_v6 = vpack.i.bf16 %v1750_v2, %v1682_v55  ;;  %v2297_v7 = vpack.i.bf16 %v1752_v4, %v1684_v56 }
 0x738   : > { %2293 = vrot.lane.b32.xlu0 %v2292_v5, %s2496_s21  ;;  %2288 = vrot.lane.b32.xlu1 %v2287_v6, %s2497_s22  ;;  %s2414_s21 = sshll.u32 %s2499_s25, 4  ;;  %s2415_s21 = int_to_ptr.vmem [resolvable:$false] %s2414_s21 }
 0x739   : > { %p2417_p10 = scmp.lt.s32.totalorder %s2990_s10, %s2415_s21 }
 0x73c   : > { %2298 = vrot.lane.b32.xlu1 %v2297_v7, %s2498_s15  ;;  %s3082_s15 = sld [smem:[#allocation15_spill]] }
 0x742   : > { %v2096_v54 = vld [vmem:[%s3082_s15] ss:$0 sm:$0xff]  ;;  %s2416_s15 = scalar_lea.vmem %s2415_s21, 512 }
 0x743   : > { %p2418_p13 = scmp.lt.s32.totalorder %s2416_s15, %s2410_s29 }
 0x745   : > { %p2419_p3 = por %p2418_p13, %p2417_p10 }
 0x747   : > { %p2420_p7 = pnand %p2419_p3, %p2413_p8 }
 0x7aa   : > { %v2294_v8 = vpop.permute.xlu0 %2293  ;;  %v2289_v9 = vpop.permute.xlu1 %2288 }
 0x7ab   : > { %v2291_v10 = vunpack.i.h.bf16 %v2289_v9  ;;  %v2290_v11 = vunpack.i.l.bf16 %v2289_v9  ;;  %v2296_v12 = vunpack.i.h.bf16 %v2294_v8  ;;  %v2295_v48 = vunpack.i.l.bf16 %v2294_v8 }
 0x7ad   : > { %v1777_v13 = vsel %vm997_vm4, %v1681_v44, %v2290_v11  ;;  %v1778_v14 = vsel %vm997_vm4, %v1749_v3, %v2291_v10 }
 0x7ae   : > { %v2299_v15 = vpop.permute.xlu1 %2298  ;;  %v1780_v45 = vsel %vm1779_vm5, %v1777_v13, %v2295_v48  ;;  %v1781_v18 = vsel %vm1779_vm5, %v1778_v14, %v2296_v12 }
 0x7af   : > { %v2301_v16 = vunpack.i.h.bf16 %v2299_v15  ;;  %v2300_v17 = vunpack.i.l.bf16 %v2299_v15 }
 0x7b1   : > { %v1782_v19 = vsel %vm485_vm2, %v1780_v45, %v2300_v17  ;;  %v1783_v59 = vsel %vm485_vm2, %v1781_v18, %v2301_v16 }
 0x7b2   : > { %v1784_v38 = vpack.c.bf16 %v1783_v59, %v1782_v19 }
 0x7b4   : > { %2203 = vmatmul.mubr.msk.bf16.vlgmr.msra.gmra.mrb[20].mxu0 %vm535_vm3, %v1784_v38 }
 0x887   : > { %v1845_v20 = vpop.f32.mrb[20].mxu0 }
 0x888   : > { %v1846_v41 = vadd.f32 %v2091_v43, %v1845_v20  ;;  %v2204_v21 = vpop.f32.mrb[21].mxu0 }
 0x889   : > { %v1848_v29 = vpop.f32.mrb[22].mxu0 }
 0x88a   : > { %v1849_v22 = vadd.f32 %v2091_v43, %v1848_v29  ;;  %v2205_v23 = vpop.f32.mrb[23].mxu0  ;;  %v1854_v24 = vsel %vm535_vm3, %v1846_v41, 0.0 }
 0x88b   : > { %1855 = vadd.xlane.f32.xlu1 %v1854_v24 }
 0x88c   : > { %v1857_v25 = vsel %vm535_vm3, %v1849_v22, 0.0 }
 0x88d   : > { %1858 = vadd.xlane.f32.xlu0 %v1857_v25 }
 0x918   : > { %v1856_v26 = vpop.xlane.xlu1 %1855 }
 0x919   : > { %v1860_v27 = vmul.f32 0.03125, %v1856_v26 }
 0x91a   : > { %v1859_v28 = vpop.xlane.xlu0 %1858 }
 0x91b   : > { %v1862_v30 = vsub.f32 %v1846_v41, %v1860_v27  ;;  %v1861_v31 = vmul.f32 0.03125, %v1859_v28 }
 0x91d   : > { %v1863_v32 = vsub.f32 %v1849_v22, %v1861_v31  ;;  %v1864_v51 = vmul.f32 %v1862_v30, %v1862_v30 }
 0x91f   : > { %v1866_v58 = vsel %vm535_vm3, %v1864_v51, 0.0  ;;  %v1865_v33 = vmul.f32 %v1863_v32, %v1863_v32 }
 0x920   : > { %1867 = vadd.xlane.f32.xlu0 %v1866_v58 }
 0x921   : > { %v1869_v34 = vsel %vm535_vm3, %v1865_v33, 0.0 }
 0x922   : > { %1870 = vadd.xlane.f32.xlu1 %v1869_v34 }
 0x9ad   : > { %v1868_v37 = vpop.xlane.xlu0 %1867 }
 0x9ae   : > { %v1872_v39 = vmul.f32 0.03125, %v1868_v37 }
 0x9af   : > { %v1871_v40 = vpop.xlane.xlu1 %1870 }
 0x9b0   : > { %v1874_v42 = vadd.f32 1e-06, %v1872_v39  ;;  %v1873_v46 = vmul.f32 0.03125, %v1871_v40 }
 0x9b2   : > { %2348 = vrsqrt.f32 %v1874_v42  ;;  %v1875_v47 = vadd.f32 1e-06, %v1873_v46 }
 0x9b4   : > { %2350 = vrsqrt.f32 %v1875_v47 }
 0x9bc   : > { %v2349_v49 = vpop.eup %2348 }
 0x9bd   : > { %v1878_v62 = vmul.f32 %v2349_v49, %v1862_v30 }
 0x9be   : > { %v2351_v50 = vpop.eup %2350 }
 0x9bf   : > { %v1886_v52 = vmul.f32 %v2095_v0, %v1878_v62  ;;  %v1879_v53 = vmul.f32 %v2351_v50, %v1863_v32 }
 0x9c1   : > { %v1887_v44 = vmul.f32 %v2095_v0, %v1879_v53  ;;  %v1894_v55 = vadd.f32 %v2096_v54, %v1886_v52 }
 0x9c3   : > { %v1895_v56 = vadd.f32 %v2096_v54, %v1887_v44 }
 0x9c5   : > { %v1896_v57 = vpack.c.bf16 %v1895_v56, %v1894_v55 }
 0x9c7   : > { %2211 = vmatmul.mubr.msk.bf16.vlgmr.msra.gmra.mrb[20].mxu1 %vm535_vm3, %v1896_v57 }
 0xa9a   : > { %v1950_v60 = vpop.f32.mrb[20].mxu1 }
 0xa9b   : > { %1957 = vst.msk [vmem:[%s470_s18] sm:$0xff] %vm535_vm3, %v1950_v60  ;;  %v2212_v61 = vpop.f32.mrb[21].mxu1 }
 0xa9c   : > { %v1953_v63 = vpop.f32.mrb[22].mxu1 }
 0xa9d   : > { %1958 = vst.msk [vmem:[%s470_s18 + $0x8] sm:$0xff] %vm535_vm3, %v1953_v63  ;;  %v2213_v1 = vpop.f32.mrb[23].mxu1 }
 0xa9e   : > { %2423 = shalt.err (!%p2420_p7)
}
 0xa9f   : > { %s2424_s30 = scalar_lea.hbm %s2996_s17, 256  ;;  %s2428_s14 = scalar_lea.hbm %s3083_s23, 512 }
 0xaa0   : > { %p2425_p9 = scmp.ne.s32.totalorder %s2996_s17, %s2424_s30  ;;  %p2429_p0 = scmp.lt.u32.totalorder %s2996_s17, %s3083_s23 }
 0xaa1   : > { %p2430_p1 = scmp.lt.u32.totalorder %s2428_s14, %s2424_s30  ;;  %p2432_p4 = scmp.lt.u32.totalorder %s2424_s30, %s2996_s17 }
 0xaa2   : > { %p2426_p2 = pnand %p2425_p9, %p2662_p12 }
 0xaa3   : > { %p2431_p11 = por %p2430_p1, %p2429_p0 }
 0xaa4   : > { %p2427_p5 = pneg %p2426_p2 }
 0xaa5   : > { %p2433_p6 = por %p2432_p4, %p2431_p11 }
 0xaa7   : > { %p2434_p8 = pnand %p2433_p6, %p2427_p5 }
 0xaa9   : > { %2437 = shalt.err (!%p2434_p8)
}
 0xaaa   : > { %s2500_s29 = smov 128  }
 0xaab   : > { %2220 = dma.vmem_to_hbm [thread:$0]  (%p2662_p12), %s2990_s10, 256, %s2996_s17, %s1960_s19, %s2500_s29, %s2500_s29, %s2497_s22  }
 0xaac PF: > { %s3084_s21 = sld [smem:[#allocation11_spill]]  ;;  %s3085_s15 = sld [smem:[#allocation12_spill]] }
 0xaad   : > { %p3087_p13 = scmp.ge.s32.totalorder %s2480_s28, 2 }
 0xab2   : > { %s1988_s18 = sand.u32 1, %s3084_s21   ;;  %p3086_p10 = scmp.ne.s32.totalorder %s3085_s15, 0 }
 0xab3   : > { %s1989_s30 = scalar_lea.sflag [#allocation4], %s1988_s18 }
 0xab4   : > { %p2231_p3 = pnand %p3087_p13, %p3086_p10 }
 0xab6   : > { %2463 = dma.done.wait (!%p2231_p3), %s1989_s30, 256  }
 0xab7   : > { %2465 = vsyncadd (!%p2231_p3), %s1989_s30, 4294967040  ;;  %s3088_s28 = sld [smem:[#allocation13_spill]]  ;;  %s3089_s25 = smov %s2472_s26 }
 0xab8   : > { %s3090_s26 = smov %s2476_s27  ;;  %s3091_s27 = smov %s2658_s20 }
 0xabd   : > { %p27_p7 = scmp.ge.s32.totalorder %s3088_s28, 4  }
 0xabf   :  { %29 = sbr.rel (!%p27_p7) target bundleno = 10 (0xa), region = 121 }
 0xac6   :  { %1994 = vsyncpa [#allocation3], 1 }
 0xac7   :  { %1996 = vsyncpa [#allocation3 + $0x1], 1 }
 0xac8   :  { %1997 = vsyncpa [#allocation6], 1 }
 0xac9   :  { %1998 = vsyncpa [#allocation4], 1 }
 0xaca   :  { %2000 = vsyncpa [#allocation4 + $0x1], 1 }

</bundles_post_ra>
